<compile_context>
chip_gen: v7x
topology: tpu7x:2x2x1
jax: 0.10.0
libtpu: 0.0.40
codegen_flags: <defaults>
</compile_context>

<pallas_src>
import functools

import jax
import jax.numpy as jnp
from jax.experimental import pallas as pl
from jax.experimental.pallas import tpu as pltpu


_SQRT_HALF = 0.7071067811865476


def _erf(z):
    # Abramowitz & Stegun 7.1.26 polynomial (max abs err ~1.5e-7).  Uses only
    # exp / mul / add / div / where, all of which lower cleanly in Mosaic, so we do
    # not depend on an erf primitive lowering for the exact (torch.nn.GELU) GELU.
    a1, a2, a3, a4, a5 = 0.254829592, -0.284496736, 1.421413741, -1.453152027, 1.061405429
    p = 0.3275911
    za = jnp.abs(z)
    t = 1.0 / (1.0 + p * za)
    poly = ((((a5 * t + a4) * t + a3) * t + a2) * t + a1) * t
    e = 1.0 - poly * jnp.exp(-za * za)
    return jnp.where(z >= 0, e, -e)


def _gelu_exact(x):
    return 0.5 * x * (1.0 + _erf(x * _SQRT_HALF))


def _layernorm(t, w, b, eps):
    # Single-pass statistics (mean + mean-of-squares): halves the cross-lane reductions.
    mu = jnp.mean(t, axis=-1, keepdims=True)
    msq = jnp.mean(t * t, axis=-1, keepdims=True)
    var = msq - mu * mu
    return (t - mu) * jax.lax.rsqrt(var + eps) * w + b


# ---------------------------------------------------------------------------
# Kernel: one batch per grid step, all layers / heads fused, weights VMEM-resident
# ---------------------------------------------------------------------------
def _transformer_kernel(
    x_ref,        # (N, D)   f32   activation rows of this batch
    mask_ref,     # (H, D)   bf16  per-head feature mask (host-precomputed)
    wqkv_ref,     # (depth, D, 3D) bf16
    wout_ref,     # (depth, D, D)  bf16
    bout_ref,     # (depth, 1, D)  f32
    ln1w_ref,     # (depth, 1, D)  f32
    ln1b_ref,     # (depth, 1, D)  f32
    wff1_ref,     # (depth, D, 4D) bf16
    bff1_ref,     # (depth, 1, 4D) f32
    wff2_ref,     # (depth, 4D, D) bf16
    bff2_ref,     # (depth, 1, D)  f32
    ln2w_ref,     # (depth, 1, D)  f32
    ln2b_ref,     # (depth, 1, D)  f32
    o_ref,        # (N, D)
    *,
    heads: int,
    depth: int,
    eps: float = 1e-5,
):
    f32 = jnp.float32
    bf16 = jnp.bfloat16
    N, D = x_ref.shape
    H = heads
    scale = float(D) ** -0.5      # NOTE: faithful to the module (dim**-0.5, not dim_head**-0.5)

    mask3 = mask_ref[...][:, None, :]            # (H, 1, D) bf16, hoisted out of the depth loop
    x = x_ref[...].astype(f32)                   # (N, D)

    # Static unrolled depth loop is fine at depth=2.
    # TODO(synk): for depth > ~8 switch to lax.fori_loop (or a depth grid axis) so vreg
    # pressure / compile time stay bounded.
    for l in range(depth):
        # ---------------- QuantumAttention (all heads at once) -------------
        xb = x.astype(bf16)
        qkv = jnp.dot(xb, wqkv_ref[l], preferred_element_type=f32)          # (N, 3D)
        q = qkv[:, :D].astype(bf16)
        k = qkv[:, D:2 * D].astype(bf16)
        v = qkv[:, 2 * D:].astype(bf16)

        # Per-head masked K / V slabs (head h keeps only its dim_head feature columns)
        # and a head-broadcast Q; everything bf16 into the MXU, f32 accumulation.
        k3 = k[None, :, :] * mask3                                           # (H, N, D)
        v3 = v[None, :, :] * mask3                                           # (H, N, D)
        q3 = jnp.broadcast_to(q[None, :, :], (H, N, D))                      # (H, N, D)

        # Scores + softmax per (head, query): max/sum are per-head, so one head's
        # small scores can never underflow against another head's max (NaN hazard fixed).
        s3 = jnp.einsum("hid,hjd->hij", q3, k3, preferred_element_type=f32) * scale
        m3 = jnp.max(s3, axis=-1, keepdims=True)
        p3 = jnp.exp(s3 - m3)
        denom = jnp.sum(p3, axis=-1, keepdims=True)
        attn3 = (p3 * pl.reciprocal(denom, approx=True)).astype(bf16)        # (H, N, N)

        out3 = jnp.einsum("hij,hjd->hid", attn3, v3, preferred_element_type=f32)  # (H, N, D)
        attn_out = jnp.sum(out3, axis=0)   # (N, D): masked head outputs sum == concat over heads

        proj = jnp.dot(attn_out.astype(bf16), wout_ref[l],
                       preferred_element_type=f32) + bout_ref[l]

        # ---------------- residual + LayerNorm 1 ---------------------------
        y = _layernorm(proj + x, ln1w_ref[l], ln1b_ref[l], eps)

        # ---------------- FeedForward: Linear -> exact GELU -> Linear ------
        h = jnp.dot(y.astype(bf16), wff1_ref[l], preferred_element_type=f32) + bff1_ref[l]
        h = _gelu_exact(h)
        ff = jnp.dot(h.astype(bf16), wff2_ref[l], preferred_element_type=f32) + bff2_ref[l]

        # ---------------- residual + LayerNorm 2 ---------------------------
        x = _layernorm(ff + y, ln2w_ref[l], ln2b_ref[l], eps)

    # (N, D) = (8, 32) output uses 32/128 lanes -> masked vst; informational only at this size.
    o_ref[...] = x.astype(o_ref.dtype)


# ---------------------------------------------------------------------------
# Wrapper: batch grid ("parallel" for v7x 2-TC), constant-index resident weights
# ---------------------------------------------------------------------------
def consciousness_transformer(x, params, heads):
    B, N, D = x.shape
    depth = params["wqkv"].shape[0]
    dh = D // heads

    x_flat = x.reshape(B * N, D)           # layout plumbing in the wrapper (free)

    # Host-precomputed per-head feature mask: mask[h, j] = 1 iff j // dh == h.
    head_mask = (jnp.arange(D)[None, :] // dh == jnp.arange(heads)[:, None]).astype(jnp.bfloat16)

    bf16 = jnp.bfloat16
    mat = lambda n: params[n].astype(bf16)   # MXU operands -> bf16 (single-pass matmuls)
    vec = lambda n: params[n]                # biases / LayerNorm params stay f32

    inputs = [
        x_flat, head_mask,
        mat("wqkv"), mat("wout"), vec("bout"),
        vec("ln1w"), vec("ln1b"),
        mat("wff1"), vec("bff1"), mat("wff2"), vec("bff2"),
        vec("ln2w"), vec("ln2b"),
    ]

    kernel = functools.partial(_transformer_kernel, heads=heads, depth=depth)

    # Constant block index across the batch grid -> masks/weights DMA'd once and stay
    # VMEM-resident; only the (N, D) activation slab changes per step.
    def const_spec(a):
        nd = a.ndim
        return pl.BlockSpec(a.shape, lambda b, _nd=nd: (0,) * _nd)

    in_specs = [pl.BlockSpec((N, D), lambda b: (b, 0))] + [const_spec(a) for a in inputs[1:]]
    out_specs = pl.BlockSpec((N, D), lambda b: (b, 0))

    out_flat = pl.pallas_call(
        kernel,
        out_shape=jax.ShapeDtypeStruct((B * N, D), x.dtype),
        grid=(B,),
        in_specs=in_specs,
        out_specs=out_specs,
        compiler_params=pltpu.CompilerParams(dimension_semantics=("parallel",)),
    )(*inputs)
    # TODO(synk): if dim scales (>= ~512), the all-depth-resident weights exceed v7x's
    # 64 MiB VMEM / the 32 MiB default scoped limit: move depth to an "arbitrary" grid
    # axis with per-layer weight BlockSpecs (index_map = lambda b, l: (l, 0, 0),
    # pipeline_mode=pl.Buffered(2)) so next-layer weights stream behind the matmuls.
    return out_flat.reshape(B, N, D)


# ---------------------------------------------------------------------------
# Deterministic parameter construction (stacked along depth, f32 master copies)
# ---------------------------------------------------------------------------
def make_params(key, dim, depth):
    specs = {
        "wqkv": ((dim, 3 * dim), 0.02, 0.0),
        "wout": ((dim, dim), 0.02, 0.0),
        "bout": ((1, dim), 0.02, 0.0),
        "ln1w": ((1, dim), 0.05, 1.0),
        "ln1b": ((1, dim), 0.05, 0.0),
        "wff1": ((dim, 4 * dim), 0.02, 0.0),
        "bff1": ((1, 4 * dim), 0.02, 0.0),
        "wff2": ((4 * dim, dim), 0.02, 0.0),
        "bff2": ((1, dim), 0.02, 0.0),
        "ln2w": ((1, dim), 0.05, 1.0),
        "ln2b": ((1, dim), 0.05, 0.0),
    }
    params = {}
    for i, (name, (shape, scl, off)) in enumerate(specs.items()):
        layers = []
        for l in range(depth):
            k = jax.random.fold_in(key, i * 1000 + l)
            layers.append(off + scl * jax.random.normal(k, shape, jnp.float32))
        params[name] = jnp.stack(layers)
    return params


# ---------------------------------------------------------------------------
# Pure-JAX f32 reference (mirrors the PyTorch forward) for correctness check
# ---------------------------------------------------------------------------
def reference(x, params, heads, eps=1e-5):
    depth = params["wqkv"].shape[0]

    def layernorm(t, w, b):
        mu = jnp.mean(t, axis=-1, keepdims=True)
        var = jnp.mean((t - mu) ** 2, axis=-1, keepdims=True)
        return (t - mu) * jax.lax.rsqrt(var + eps) * w + b

    b, n, d = x.shape
    scale = d ** (-0.5)
    for l in range(depth):
        qkv = x @ params["wqkv"][l]
        q, k, v = jnp.split(qkv, 3, axis=-1)
        split = lambda t: t.reshape(b, n, heads, d // heads).transpose(0, 2, 1, 3)
        q, k, v = split(q), split(k), split(v)
        dots = jnp.einsum("bhnd,bhmd->bhnm", q, k) * scale
        attn = jax.nn.softmax(dots, axis=-1)
        out = jnp.einsum("bhnm,bhmd->bhnd", attn, v)
        out = out.transpose(0, 2, 1, 3).reshape(b, n, d)
        attn_out = out @ params["wout"][l] + params["bout"][l]
        y = layernorm(attn_out + x, params["ln1w"][l], params["ln1b"][l])
        h = jax.nn.gelu(y @ params["wff1"][l] + params["bff1"][l], approximate=False)
        ff = h @ params["wff2"][l] + params["bff2"][l]
        x = layernorm(ff + y, params["ln2w"][l], params["ln2b"][l])
    return x


if __name__ == "__main__":
    # Small shapes consistent with the module: dim=32, depth=2, heads=8, dim_head=4.
    B, N, D = 2, 8, 32
    DEPTH, HEADS = 2, 8

    key = jax.random.PRNGKey(0)
    kx, kp = jax.random.split(key)
    x = jax.random.normal(kx, (B, N, D), jnp.float32)
    params = make_params(kp, D, DEPTH)

    out = consciousness_transformer(x, params, HEADS)
    out = jax.block_until_ready(out)

    ref = reference(x, params, HEADS)
    assert out.shape == (B, N, D)
    max_err = float(jnp.max(jnp.abs(out - ref)))
    # bf16 MXU operands + approx reciprocal in the kernel vs a pure-f32 reference:
    # use a bf16-appropriate tolerance (observed error is ~1e-3 or below at these shapes).
    assert max_err < 5e-3, f"mismatch vs reference (max abs err {max_err})"

    print("KERNEL_OK")
</pallas_src>

<mosaic_0001>
module attributes {stable_mosaic.version = 11 : i64} {
  func.func @_transformer_kernel(%arg0: i32, %arg1: memref<8x32xf32, #tpu.memory_space<vmem>>, %arg2: memref<8x32xbf16, #tpu.memory_space<vmem>>, %arg3: memref<2x32x96xbf16, #tpu.memory_space<vmem>>, %arg4: memref<2x32x32xbf16, #tpu.memory_space<vmem>>, %arg5: memref<2x1x32xf32, #tpu.memory_space<vmem>>, %arg6: memref<2x1x32xf32, #tpu.memory_space<vmem>>, %arg7: memref<2x1x32xf32, #tpu.memory_space<vmem>>, %arg8: memref<2x32x128xbf16, #tpu.memory_space<vmem>>, %arg9: memref<2x1x128xf32, #tpu.memory_space<vmem>>, %arg10: memref<2x128x32xbf16, #tpu.memory_space<vmem>>, %arg11: memref<2x1x32xf32, #tpu.memory_space<vmem>>, %arg12: memref<2x1x32xf32, #tpu.memory_space<vmem>>, %arg13: memref<2x1x32xf32, #tpu.memory_space<vmem>>, %arg14: memref<8x32xf32, #tpu.memory_space<vmem>>) attributes {dimension_semantics = [#tpu.dimension_semantics<parallel>], iteration_bounds = array<i64: 2>, scalar_prefetch = 0 : i64, scratch_operands = 0 : i64, tpu.core_type = #tpu.core_type<tc>, window_params = [{transform_indices = @transform_0, window_bounds = array<i64: 8, 32>}, {pipeline_mode = #tpu.pipeline_mode<synchronous>, transform_indices = @transform_1, window_bounds = array<i64: 8, 32>}, {pipeline_mode = #tpu.pipeline_mode<synchronous>, transform_indices = @transform_2, window_bounds = array<i64: 2, 32, 96>}, {pipeline_mode = #tpu.pipeline_mode<synchronous>, transform_indices = @transform_3, window_bounds = array<i64: 2, 32, 32>}, {pipeline_mode = #tpu.pipeline_mode<synchronous>, transform_indices = @transform_4, window_bounds = array<i64: 2, 1, 32>}, {pipeline_mode = #tpu.pipeline_mode<synchronous>, transform_indices = @transform_5, window_bounds = array<i64: 2, 1, 32>}, {pipeline_mode = #tpu.pipeline_mode<synchronous>, transform_indices = @transform_6, window_bounds = array<i64: 2, 1, 32>}, {pipeline_mode = #tpu.pipeline_mode<synchronous>, transform_indices = @transform_7, window_bounds = array<i64: 2, 32, 128>}, {pipeline_mode = #tpu.pipeline_mode<synchronous>, transform_indices = @transform_8, window_bounds = array<i64: 2, 1, 128>}, {pipeline_mode = #tpu.pipeline_mode<synchronous>, transform_indices = @transform_9, window_bounds = array<i64: 2, 128, 32>}, {pipeline_mode = #tpu.pipeline_mode<synchronous>, transform_indices = @transform_10, window_bounds = array<i64: 2, 1, 32>}, {pipeline_mode = #tpu.pipeline_mode<synchronous>, transform_indices = @transform_11, window_bounds = array<i64: 2, 1, 32>}, {pipeline_mode = #tpu.pipeline_mode<synchronous>, transform_indices = @transform_12, window_bounds = array<i64: 2, 1, 32>}, {transform_indices = @transform_13, window_bounds = array<i64: 8, 32>}]} {
    %c0 = arith.constant 0 : index
    %c0_0 = arith.constant 0 : index
    %0 = vector.load %arg2[%c0, %c0_0] : memref<8x32xbf16, #tpu.memory_space<vmem>>, vector<8x32xbf16>
    %1 = vector.shape_cast %0 : vector<8x32xbf16> to vector<8x1x32xbf16>
    %c0_1 = arith.constant 0 : index
    %c0_2 = arith.constant 0 : index
    %2 = vector.load %arg1[%c0_1, %c0_2] : memref<8x32xf32, #tpu.memory_space<vmem>>, vector<8x32xf32>
    %3 = arith.truncf %2 : vector<8x32xf32> to vector<8x32xbf16>
    %c0_3 = arith.constant 0 : index
    %c0_4 = arith.constant 0 : index
    %c0_5 = arith.constant 0 : index
    %4 = vector.load %arg3[%c0_3, %c0_4, %c0_5] : memref<2x32x96xbf16, #tpu.memory_space<vmem>>, vector<1x32x96xbf16>
    %5 = vector.shape_cast %4 : vector<1x32x96xbf16> to vector<32x96xbf16>
    %cst = arith.constant dense<0.000000e+00> : vector<8x96xf32>
    %6 = tpu.matmul %3, %5, %cst {dimension_numbers = #tpu.dot_dimension_numbers<[1], [0], [0], [1], [0, 0, 1, 1], [], []>} : vector<8x32xbf16>, vector<32x96xbf16>, vector<8x96xf32> -> vector<8x96xf32>
    %7 = vector.extract_strided_slice %6 {offsets = [0, 0], sizes = [8, 32], strides = [1, 1]} : vector<8x96xf32> to vector<8x32xf32>
    %8 = arith.truncf %7 : vector<8x32xf32> to vector<8x32xbf16>
    %9 = vector.extract_strided_slice %6 {offsets = [0, 32], sizes = [8, 32], strides = [1, 1]} : vector<8x96xf32> to vector<8x32xf32>
    %10 = arith.truncf %9 : vector<8x32xf32> to vector<8x32xbf16>
    %11 = vector.extract_strided_slice %6 {offsets = [0, 64], sizes = [8, 32], strides = [1, 1]} : vector<8x96xf32> to vector<8x32xf32>
    %12 = arith.truncf %11 : vector<8x32xf32> to vector<8x32xbf16>
    %13 = vector.shape_cast %10 : vector<8x32xbf16> to vector<1x8x32xbf16>
    %14 = vector.broadcast %13 : vector<1x8x32xbf16> to vector<8x8x32xbf16>
    %15 = vector.broadcast %1 : vector<8x1x32xbf16> to vector<8x8x32xbf16>
    %16 = arith.mulf %14, %15 : vector<8x8x32xbf16>
    %17 = vector.shape_cast %12 : vector<8x32xbf16> to vector<1x8x32xbf16>
    %18 = vector.broadcast %17 : vector<1x8x32xbf16> to vector<8x8x32xbf16>
    %19 = vector.broadcast %1 : vector<8x1x32xbf16> to vector<8x8x32xbf16>
    %20 = arith.mulf %18, %19 : vector<8x8x32xbf16>
    %21 = vector.shape_cast %8 : vector<8x32xbf16> to vector<1x8x32xbf16>
    %22 = vector.shape_cast %21 : vector<1x8x32xbf16> to vector<1x8x32xbf16>
    %23 = vector.broadcast %22 : vector<1x8x32xbf16> to vector<8x8x32xbf16>
    "tpu.trace_start"() <{level = 10 : i32, message = "hid,hjd->hij"}> : () -> ()
    %cst_6 = arith.constant dense<0.000000e+00> : vector<8x8x8xf32>
    %24 = tpu.matmul %23, %16, %cst_6 {dimension_numbers = #tpu.dot_dimension_numbers<[2], [2], [1], [1], [0, 0, 0, 1, 1, 1], [0], [0]>} : vector<8x8x32xbf16>, vector<8x8x32xbf16>, vector<8x8x8xf32> -> vector<8x8x8xf32>
    "tpu.trace_stop"() : () -> ()
    %cst_7 = arith.constant 0.176776692 : f32
    %25 = vector.broadcast %cst_7 : f32 to vector<8x8x8xf32>
    %26 = arith.mulf %24, %25 : vector<8x8x8xf32>
    %cst_8 = arith.constant dense<0xFF800000> : vector<8x8xf32>
    %27 = vector.multi_reduction <maximumf>, %26, %cst_8 [2] : vector<8x8x8xf32> to vector<8x8xf32>
    %28 = vector.shape_cast %27 : vector<8x8xf32> to vector<8x8x1xf32>
    %29 = vector.broadcast %28 : vector<8x8x1xf32> to vector<8x8x8xf32>
    %30 = arith.subf %26, %29 : vector<8x8x8xf32>
    %31 = math.exp %30 : vector<8x8x8xf32>
    %cst_9 = arith.constant dense<0.000000e+00> : vector<8x8xf32>
    %32 = vector.multi_reduction <add>, %31, %cst_9 [2] : vector<8x8x8xf32> to vector<8x8xf32>
    %33 = vector.shape_cast %32 : vector<8x8xf32> to vector<8x8x1xf32>
    %34 = tpu.reciprocal %33 {approx = true} : vector<8x8x1xf32> -> vector<8x8x1xf32>
    %35 = vector.broadcast %34 : vector<8x8x1xf32> to vector<8x8x8xf32>
    %36 = arith.mulf %31, %35 : vector<8x8x8xf32>
    %37 = arith.truncf %36 : vector<8x8x8xf32> to vector<8x8x8xbf16>
    "tpu.trace_start"() <{level = 10 : i32, message = "hij,hjd->hid"}> : () -> ()
    %cst_10 = arith.constant dense<0.000000e+00> : vector<8x8x32xf32>
    %38 = tpu.matmul %37, %20, %cst_10 {dimension_numbers = #tpu.dot_dimension_numbers<[2], [1], [1], [2], [0, 0, 0, 1, 1, 2], [0], [0]>} : vector<8x8x8xbf16>, vector<8x8x32xbf16>, vector<8x8x32xf32> -> vector<8x8x32xf32>
    "tpu.trace_stop"() : () -> ()
    %cst_11 = arith.constant dense<0.000000e+00> : vector<8x32xf32>
    %39 = vector.multi_reduction <add>, %38, %cst_11 [0] : vector<8x8x32xf32> to vector<8x32xf32>
    %40 = arith.truncf %39 : vector<8x32xf32> to vector<8x32xbf16>
    %c0_12 = arith.constant 0 : index
    %c0_13 = arith.constant 0 : index
    %c0_14 = arith.constant 0 : index
    %41 = vector.load %arg4[%c0_12, %c0_13, %c0_14] : memref<2x32x32xbf16, #tpu.memory_space<vmem>>, vector<1x32x32xbf16>
    %42 = vector.shape_cast %41 : vector<1x32x32xbf16> to vector<32x32xbf16>
    %cst_15 = arith.constant dense<0.000000e+00> : vector<8x32xf32>
    %43 = tpu.matmul %40, %42, %cst_15 {dimension_numbers = #tpu.dot_dimension_numbers<[1], [0], [0], [1], [0, 0, 1, 1], [], []>} : vector<8x32xbf16>, vector<32x32xbf16>, vector<8x32xf32> -> vector<8x32xf32>
    %c0_16 = arith.constant 0 : index
    %c0_17 = arith.constant 0 : index
    %c0_18 = arith.constant 0 : index
    %44 = vector.load %arg5[%c0_16, %c0_17, %c0_18] : memref<2x1x32xf32, #tpu.memory_space<vmem>>, vector<1x1x32xf32>
    %45 = vector.shape_cast %44 : vector<1x1x32xf32> to vector<1x32xf32>
    %46 = vector.broadcast %45 : vector<1x32xf32> to vector<8x32xf32>
    %47 = arith.addf %43, %46 : vector<8x32xf32>
    %48 = arith.addf %47, %2 : vector<8x32xf32>
    %c0_19 = arith.constant 0 : index
    %c0_20 = arith.constant 0 : index
    %c0_21 = arith.constant 0 : index
    %49 = vector.load %arg6[%c0_19, %c0_20, %c0_21] : memref<2x1x32xf32, #tpu.memory_space<vmem>>, vector<1x1x32xf32>
    %50 = vector.shape_cast %49 : vector<1x1x32xf32> to vector<1x32xf32>
    %c0_22 = arith.constant 0 : index
    %c0_23 = arith.constant 0 : index
    %c0_24 = arith.constant 0 : index
    %51 = vector.load %arg7[%c0_22, %c0_23, %c0_24] : memref<2x1x32xf32, #tpu.memory_space<vmem>>, vector<1x1x32xf32>
    %52 = vector.shape_cast %51 : vector<1x1x32xf32> to vector<1x32xf32>
    %cst_25 = arith.constant dense<0.000000e+00> : vector<8xf32>
    %53 = vector.multi_reduction <add>, %48, %cst_25 [1] : vector<8x32xf32> to vector<8xf32>
    %54 = vector.shape_cast %53 : vector<8xf32> to vector<8x1xf32>
    %cst_26 = arith.constant 3.200000e+01 : f32
    %55 = vector.broadcast %cst_26 : f32 to vector<8x1xf32>
    %56 = arith.divf %54, %55 : vector<8x1xf32>
    %57 = arith.mulf %48, %48 : vector<8x32xf32>
    %cst_27 = arith.constant dense<0.000000e+00> : vector<8xf32>
    %58 = vector.multi_reduction <add>, %57, %cst_27 [1] : vector<8x32xf32> to vector<8xf32>
    %59 = vector.shape_cast %58 : vector<8xf32> to vector<8x1xf32>
    %cst_28 = arith.constant 3.200000e+01 : f32
    %60 = vector.broadcast %cst_28 : f32 to vector<8x1xf32>
    %61 = arith.divf %59, %60 : vector<8x1xf32>
    %62 = arith.mulf %56, %56 : vector<8x1xf32>
    %63 = arith.subf %61, %62 : vector<8x1xf32>
    %64 = vector.broadcast %56 : vector<8x1xf32> to vector<8x32xf32>
    %65 = arith.subf %48, %64 : vector<8x32xf32>
    %cst_29 = arith.constant 9.99999974E-6 : f32
    %66 = vector.broadcast %cst_29 : f32 to vector<8x1xf32>
    %67 = arith.addf %63, %66 : vector<8x1xf32>
    %68 = math.rsqrt %67 : vector<8x1xf32>
    %69 = vector.broadcast %68 : vector<8x1xf32> to vector<8x32xf32>
    %70 = arith.mulf %65, %69 : vector<8x32xf32>
    %71 = vector.broadcast %50 : vector<1x32xf32> to vector<8x32xf32>
    %72 = arith.mulf %70, %71 : vector<8x32xf32>
    %73 = vector.broadcast %52 : vector<1x32xf32> to vector<8x32xf32>
    %74 = arith.addf %72, %73 : vector<8x32xf32>
    %75 = arith.truncf %74 : vector<8x32xf32> to vector<8x32xbf16>
    %c0_30 = arith.constant 0 : index
    %c0_31 = arith.constant 0 : index
    %c0_32 = arith.constant 0 : index
    %76 = vector.load %arg8[%c0_30, %c0_31, %c0_32] : memref<2x32x128xbf16, #tpu.memory_space<vmem>>, vector<1x32x128xbf16>
    %77 = vector.shape_cast %76 : vector<1x32x128xbf16> to vector<32x128xbf16>
    %cst_33 = arith.constant dense<0.000000e+00> : vector<8x128xf32>
    %78 = tpu.matmul %75, %77, %cst_33 {dimension_numbers = #tpu.dot_dimension_numbers<[1], [0], [0], [1], [0, 0, 1, 1], [], []>} : vector<8x32xbf16>, vector<32x128xbf16>, vector<8x128xf32> -> vector<8x128xf32>
    %c0_34 = arith.constant 0 : index
    %c0_35 = arith.constant 0 : index
    %c0_36 = arith.constant 0 : index
    %79 = vector.load %arg9[%c0_34, %c0_35, %c0_36] : memref<2x1x128xf32, #tpu.memory_space<vmem>>, vector<1x1x128xf32>
    %80 = vector.shape_cast %79 : vector<1x1x128xf32> to vector<1x128xf32>
    %81 = vector.broadcast %80 : vector<1x128xf32> to vector<8x128xf32>
    %82 = arith.addf %78, %81 : vector<8x128xf32>
    %cst_37 = arith.constant 5.000000e-01 : f32
    %83 = vector.broadcast %cst_37 : f32 to vector<8x128xf32>
    %84 = arith.mulf %83, %82 : vector<8x128xf32>
    %cst_38 = arith.constant 0.707106769 : f32
    %85 = vector.broadcast %cst_38 : f32 to vector<8x128xf32>
    %86 = arith.mulf %82, %85 : vector<8x128xf32>
    %87 = math.absf %86 : vector<8x128xf32>
    %cst_39 = arith.constant 0.327591091 : f32
    %88 = vector.broadcast %cst_39 : f32 to vector<8x128xf32>
    %89 = arith.mulf %88, %87 : vector<8x128xf32>
    %cst_40 = arith.constant 1.000000e+00 : f32
    %90 = vector.broadcast %cst_40 : f32 to vector<8x128xf32>
    %91 = arith.addf %90, %89 : vector<8x128xf32>
    %cst_41 = arith.constant 1.000000e+00 : f32
    %92 = vector.broadcast %cst_41 : f32 to vector<8x128xf32>
    %93 = arith.divf %92, %91 : vector<8x128xf32>
    %cst_42 = arith.constant 1.06140542 : f32
    %94 = vector.broadcast %cst_42 : f32 to vector<8x128xf32>
    %95 = arith.mulf %94, %93 : vector<8x128xf32>
    %cst_43 = arith.constant -1.45315206 : f32
    %96 = vector.broadcast %cst_43 : f32 to vector<8x128xf32>
    %97 = arith.addf %95, %96 : vector<8x128xf32>
    %98 = arith.mulf %97, %93 : vector<8x128xf32>
    %cst_44 = arith.constant 1.42141378 : f32
    %99 = vector.broadcast %cst_44 : f32 to vector<8x128xf32>
    %100 = arith.addf %98, %99 : vector<8x128xf32>
    %101 = arith.mulf %100, %93 : vector<8x128xf32>
    %cst_45 = arith.constant -0.284496725 : f32
    %102 = vector.broadcast %cst_45 : f32 to vector<8x128xf32>
    %103 = arith.addf %101, %102 : vector<8x128xf32>
    %104 = arith.mulf %103, %93 : vector<8x128xf32>
    %cst_46 = arith.constant 0.254829586 : f32
    %105 = vector.broadcast %cst_46 : f32 to vector<8x128xf32>
    %106 = arith.addf %104, %105 : vector<8x128xf32>
    %107 = arith.mulf %106, %93 : vector<8x128xf32>
    %cst_47 = arith.constant 0.000000e+00 : f32
    %108 = vector.broadcast %cst_47 : f32 to vector<8x128xf32>
    %109 = arith.subf %108, %87 : vector<8x128xf32>
    %110 = arith.mulf %109, %87 : vector<8x128xf32>
    %111 = math.exp %110 : vector<8x128xf32>
    %112 = arith.mulf %107, %111 : vector<8x128xf32>
    %cst_48 = arith.constant 1.000000e+00 : f32
    %113 = vector.broadcast %cst_48 : f32 to vector<8x128xf32>
    %114 = arith.subf %113, %112 : vector<8x128xf32>
    %cst_49 = arith.constant 0.000000e+00 : f32
    %115 = vector.broadcast %cst_49 : f32 to vector<8x128xf32>
    %116 = arith.cmpf oge, %86, %115 : vector<8x128xf32>
    %cst_50 = arith.constant 0.000000e+00 : f32
    %117 = vector.broadcast %cst_50 : f32 to vector<8x128xf32>
    %118 = arith.subf %117, %114 : vector<8x128xf32>
    %119 = arith.select %116, %114, %118 : vector<8x128xi1>, vector<8x128xf32>
    %cst_51 = arith.constant 1.000000e+00 : f32
    %120 = vector.broadcast %cst_51 : f32 to vector<8x128xf32>
    %121 = arith.addf %120, %119 : vector<8x128xf32>
    %122 = arith.mulf %84, %121 : vector<8x128xf32>
    %123 = arith.truncf %122 : vector<8x128xf32> to vector<8x128xbf16>
    %c0_52 = arith.constant 0 : index
    %c0_53 = arith.constant 0 : index
    %c0_54 = arith.constant 0 : index
    %124 = vector.load %arg10[%c0_52, %c0_53, %c0_54] : memref<2x128x32xbf16, #tpu.memory_space<vmem>>, vector<1x128x32xbf16>
    %125 = vector.shape_cast %124 : vector<1x128x32xbf16> to vector<128x32xbf16>
    %cst_55 = arith.constant dense<0.000000e+00> : vector<8x32xf32>
    %126 = tpu.matmul %123, %125, %cst_55 {dimension_numbers = #tpu.dot_dimension_numbers<[1], [0], [0], [1], [0, 0, 1, 1], [], []>} : vector<8x128xbf16>, vector<128x32xbf16>, vector<8x32xf32> -> vector<8x32xf32>
    %c0_56 = arith.constant 0 : index
    %c0_57 = arith.constant 0 : index
    %c0_58 = arith.constant 0 : index
    %127 = vector.load %arg11[%c0_56, %c0_57, %c0_58] : memref<2x1x32xf32, #tpu.memory_space<vmem>>, vector<1x1x32xf32>
    %128 = vector.shape_cast %127 : vector<1x1x32xf32> to vector<1x32xf32>
    %129 = vector.broadcast %128 : vector<1x32xf32> to vector<8x32xf32>
    %130 = arith.addf %126, %129 : vector<8x32xf32>
    %131 = arith.addf %130, %74 : vector<8x32xf32>
    %c0_59 = arith.constant 0 : index
    %c0_60 = arith.constant 0 : index
    %c0_61 = arith.constant 0 : index
    %132 = vector.load %arg12[%c0_59, %c0_60, %c0_61] : memref<2x1x32xf32, #tpu.memory_space<vmem>>, vector<1x1x32xf32>
    %133 = vector.shape_cast %132 : vector<1x1x32xf32> to vector<1x32xf32>
    %c0_62 = arith.constant 0 : index
    %c0_63 = arith.constant 0 : index
    %c0_64 = arith.constant 0 : index
    %134 = vector.load %arg13[%c0_62, %c0_63, %c0_64] : memref<2x1x32xf32, #tpu.memory_space<vmem>>, vector<1x1x32xf32>
    %135 = vector.shape_cast %134 : vector<1x1x32xf32> to vector<1x32xf32>
    %cst_65 = arith.constant dense<0.000000e+00> : vector<8xf32>
    %136 = vector.multi_reduction <add>, %131, %cst_65 [1] : vector<8x32xf32> to vector<8xf32>
    %137 = vector.shape_cast %136 : vector<8xf32> to vector<8x1xf32>
    %cst_66 = arith.constant 3.200000e+01 : f32
    %138 = vector.broadcast %cst_66 : f32 to vector<8x1xf32>
    %139 = arith.divf %137, %138 : vector<8x1xf32>
    %140 = arith.mulf %131, %131 : vector<8x32xf32>
    %cst_67 = arith.constant dense<0.000000e+00> : vector<8xf32>
    %141 = vector.multi_reduction <add>, %140, %cst_67 [1] : vector<8x32xf32> to vector<8xf32>
    %142 = vector.shape_cast %141 : vector<8xf32> to vector<8x1xf32>
    %cst_68 = arith.constant 3.200000e+01 : f32
    %143 = vector.broadcast %cst_68 : f32 to vector<8x1xf32>
    %144 = arith.divf %142, %143 : vector<8x1xf32>
    %145 = arith.mulf %139, %139 : vector<8x1xf32>
    %146 = arith.subf %144, %145 : vector<8x1xf32>
    %147 = vector.broadcast %139 : vector<8x1xf32> to vector<8x32xf32>
    %148 = arith.subf %131, %147 : vector<8x32xf32>
    %cst_69 = arith.constant 9.99999974E-6 : f32
    %149 = vector.broadcast %cst_69 : f32 to vector<8x1xf32>
    %150 = arith.addf %146, %149 : vector<8x1xf32>
    %151 = math.rsqrt %150 : vector<8x1xf32>
    %152 = vector.broadcast %151 : vector<8x1xf32> to vector<8x32xf32>
    %153 = arith.mulf %148, %152 : vector<8x32xf32>
    %154 = vector.broadcast %133 : vector<1x32xf32> to vector<8x32xf32>
    %155 = arith.mulf %153, %154 : vector<8x32xf32>
    %156 = vector.broadcast %135 : vector<1x32xf32> to vector<8x32xf32>
    %157 = arith.addf %155, %156 : vector<8x32xf32>
    %158 = arith.truncf %157 : vector<8x32xf32> to vector<8x32xbf16>
    %c1 = arith.constant 1 : index
    %c0_70 = arith.constant 0 : index
    %c0_71 = arith.constant 0 : index
    %159 = vector.load %arg3[%c1, %c0_70, %c0_71] : memref<2x32x96xbf16, #tpu.memory_space<vmem>>, vector<1x32x96xbf16>
    %160 = vector.shape_cast %159 : vector<1x32x96xbf16> to vector<32x96xbf16>
    %cst_72 = arith.constant dense<0.000000e+00> : vector<8x96xf32>
    %161 = tpu.matmul %158, %160, %cst_72 {dimension_numbers = #tpu.dot_dimension_numbers<[1], [0], [0], [1], [0, 0, 1, 1], [], []>} : vector<8x32xbf16>, vector<32x96xbf16>, vector<8x96xf32> -> vector<8x96xf32>
    %162 = vector.extract_strided_slice %161 {offsets = [0, 0], sizes = [8, 32], strides = [1, 1]} : vector<8x96xf32> to vector<8x32xf32>
    %163 = arith.truncf %162 : vector<8x32xf32> to vector<8x32xbf16>
    %164 = vector.extract_strided_slice %161 {offsets = [0, 32], sizes = [8, 32], strides = [1, 1]} : vector<8x96xf32> to vector<8x32xf32>
    %165 = arith.truncf %164 : vector<8x32xf32> to vector<8x32xbf16>
    %166 = vector.extract_strided_slice %161 {offsets = [0, 64], sizes = [8, 32], strides = [1, 1]} : vector<8x96xf32> to vector<8x32xf32>
    %167 = arith.truncf %166 : vector<8x32xf32> to vector<8x32xbf16>
    %168 = vector.shape_cast %165 : vector<8x32xbf16> to vector<1x8x32xbf16>
    %169 = vector.broadcast %168 : vector<1x8x32xbf16> to vector<8x8x32xbf16>
    %170 = vector.broadcast %1 : vector<8x1x32xbf16> to vector<8x8x32xbf16>
    %171 = arith.mulf %169, %170 : vector<8x8x32xbf16>
    %172 = vector.shape_cast %167 : vector<8x32xbf16> to vector<1x8x32xbf16>
    %173 = vector.broadcast %172 : vector<1x8x32xbf16> to vector<8x8x32xbf16>
    %174 = vector.broadcast %1 : vector<8x1x32xbf16> to vector<8x8x32xbf16>
    %175 = arith.mulf %173, %174 : vector<8x8x32xbf16>
    %176 = vector.shape_cast %163 : vector<8x32xbf16> to vector<1x8x32xbf16>
    %177 = vector.shape_cast %176 : vector<1x8x32xbf16> to vector<1x8x32xbf16>
    %178 = vector.broadcast %177 : vector<1x8x32xbf16> to vector<8x8x32xbf16>
    "tpu.trace_start"() <{level = 10 : i32, message = "hid,hjd->hij"}> : () -> ()
    %cst_73 = arith.constant dense<0.000000e+00> : vector<8x8x8xf32>
    %179 = tpu.matmul %178, %171, %cst_73 {dimension_numbers = #tpu.dot_dimension_numbers<[2], [2], [1], [1], [0, 0, 0, 1, 1, 1], [0], [0]>} : vector<8x8x32xbf16>, vector<8x8x32xbf16>, vector<8x8x8xf32> -> vector<8x8x8xf32>
    "tpu.trace_stop"() : () -> ()
    %cst_74 = arith.constant 0.176776692 : f32
    %180 = vector.broadcast %cst_74 : f32 to vector<8x8x8xf32>
    %181 = arith.mulf %179, %180 : vector<8x8x8xf32>
    %cst_75 = arith.constant dense<0xFF800000> : vector<8x8xf32>
    %182 = vector.multi_reduction <maximumf>, %181, %cst_75 [2] : vector<8x8x8xf32> to vector<8x8xf32>
    %183 = vector.shape_cast %182 : vector<8x8xf32> to vector<8x8x1xf32>
    %184 = vector.broadcast %183 : vector<8x8x1xf32> to vector<8x8x8xf32>
    %185 = arith.subf %181, %184 : vector<8x8x8xf32>
    %186 = math.exp %185 : vector<8x8x8xf32>
    %cst_76 = arith.constant dense<0.000000e+00> : vector<8x8xf32>
    %187 = vector.multi_reduction <add>, %186, %cst_76 [2] : vector<8x8x8xf32> to vector<8x8xf32>
    %188 = vector.shape_cast %187 : vector<8x8xf32> to vector<8x8x1xf32>
    %189 = tpu.reciprocal %188 {approx = true} : vector<8x8x1xf32> -> vector<8x8x1xf32>
    %190 = vector.broadcast %189 : vector<8x8x1xf32> to vector<8x8x8xf32>
    %191 = arith.mulf %186, %190 : vector<8x8x8xf32>
    %192 = arith.truncf %191 : vector<8x8x8xf32> to vector<8x8x8xbf16>
    "tpu.trace_start"() <{level = 10 : i32, message = "hij,hjd->hid"}> : () -> ()
    %cst_77 = arith.constant dense<0.000000e+00> : vector<8x8x32xf32>
    %193 = tpu.matmul %192, %175, %cst_77 {dimension_numbers = #tpu.dot_dimension_numbers<[2], [1], [1], [2], [0, 0, 0, 1, 1, 2], [0], [0]>} : vector<8x8x8xbf16>, vector<8x8x32xbf16>, vector<8x8x32xf32> -> vector<8x8x32xf32>
    "tpu.trace_stop"() : () -> ()
    %cst_78 = arith.constant dense<0.000000e+00> : vector<8x32xf32>
    %194 = vector.multi_reduction <add>, %193, %cst_78 [0] : vector<8x8x32xf32> to vector<8x32xf32>
    %195 = arith.truncf %194 : vector<8x32xf32> to vector<8x32xbf16>
    %c1_79 = arith.constant 1 : index
    %c0_80 = arith.constant 0 : index
    %c0_81 = arith.constant 0 : index
    %196 = vector.load %arg4[%c1_79, %c0_80, %c0_81] : memref<2x32x32xbf16, #tpu.memory_space<vmem>>, vector<1x32x32xbf16>
    %197 = vector.shape_cast %196 : vector<1x32x32xbf16> to vector<32x32xbf16>
    %cst_82 = arith.constant dense<0.000000e+00> : vector<8x32xf32>
    %198 = tpu.matmul %195, %197, %cst_82 {dimension_numbers = #tpu.dot_dimension_numbers<[1], [0], [0], [1], [0, 0, 1, 1], [], []>} : vector<8x32xbf16>, vector<32x32xbf16>, vector<8x32xf32> -> vector<8x32xf32>
    %c1_83 = arith.constant 1 : index
    %c0_84 = arith.constant 0 : index
    %c0_85 = arith.constant 0 : index
    %199 = vector.load %arg5[%c1_83, %c0_84, %c0_85] : memref<2x1x32xf32, #tpu.memory_space<vmem>>, vector<1x1x32xf32>
    %200 = vector.shape_cast %199 : vector<1x1x32xf32> to vector<1x32xf32>
    %201 = vector.broadcast %200 : vector<1x32xf32> to vector<8x32xf32>
    %202 = arith.addf %198, %201 : vector<8x32xf32>
    %203 = arith.addf %202, %157 : vector<8x32xf32>
    %c1_86 = arith.constant 1 : index
    %c0_87 = arith.constant 0 : index
    %c0_88 = arith.constant 0 : index
    %204 = vector.load %arg6[%c1_86, %c0_87, %c0_88] : memref<2x1x32xf32, #tpu.memory_space<vmem>>, vector<1x1x32xf32>
    %205 = vector.shape_cast %204 : vector<1x1x32xf32> to vector<1x32xf32>
    %c1_89 = arith.constant 1 : index
    %c0_90 = arith.constant 0 : index
    %c0_91 = arith.constant 0 : index
    %206 = vector.load %arg7[%c1_89, %c0_90, %c0_91] : memref<2x1x32xf32, #tpu.memory_space<vmem>>, vector<1x1x32xf32>
    %207 = vector.shape_cast %206 : vector<1x1x32xf32> to vector<1x32xf32>
    %cst_92 = arith.constant dense<0.000000e+00> : vector<8xf32>
    %208 = vector.multi_reduction <add>, %203, %cst_92 [1] : vector<8x32xf32> to vector<8xf32>
    %209 = vector.shape_cast %208 : vector<8xf32> to vector<8x1xf32>
    %cst_93 = arith.constant 3.200000e+01 : f32
    %210 = vector.broadcast %cst_93 : f32 to vector<8x1xf32>
    %211 = arith.divf %209, %210 : vector<8x1xf32>
    %212 = arith.mulf %203, %203 : vector<8x32xf32>
    %cst_94 = arith.constant dense<0.000000e+00> : vector<8xf32>
    %213 = vector.multi_reduction <add>, %212, %cst_94 [1] : vector<8x32xf32> to vector<8xf32>
    %214 = vector.shape_cast %213 : vector<8xf32> to vector<8x1xf32>
    %cst_95 = arith.constant 3.200000e+01 : f32
    %215 = vector.broadcast %cst_95 : f32 to vector<8x1xf32>
    %216 = arith.divf %214, %215 : vector<8x1xf32>
    %217 = arith.mulf %211, %211 : vector<8x1xf32>
    %218 = arith.subf %216, %217 : vector<8x1xf32>
    %219 = vector.broadcast %211 : vector<8x1xf32> to vector<8x32xf32>
    %220 = arith.subf %203, %219 : vector<8x32xf32>
    %cst_96 = arith.constant 9.99999974E-6 : f32
    %221 = vector.broadcast %cst_96 : f32 to vector<8x1xf32>
    %222 = arith.addf %218, %221 : vector<8x1xf32>
    %223 = math.rsqrt %222 : vector<8x1xf32>
    %224 = vector.broadcast %223 : vector<8x1xf32> to vector<8x32xf32>
    %225 = arith.mulf %220, %224 : vector<8x32xf32>
    %226 = vector.broadcast %205 : vector<1x32xf32> to vector<8x32xf32>
    %227 = arith.mulf %225, %226 : vector<8x32xf32>
    %228 = vector.broadcast %207 : vector<1x32xf32> to vector<8x32xf32>
    %229 = arith.addf %227, %228 : vector<8x32xf32>
    %230 = arith.truncf %229 : vector<8x32xf32> to vector<8x32xbf16>
    %c1_97 = arith.constant 1 : index
    %c0_98 = arith.constant 0 : index
    %c0_99 = arith.constant 0 : index
    %231 = vector.load %arg8[%c1_97, %c0_98, %c0_99] : memref<2x32x128xbf16, #tpu.memory_space<vmem>>, vector<1x32x128xbf16>
    %232 = vector.shape_cast %231 : vector<1x32x128xbf16> to vector<32x128xbf16>
    %cst_100 = arith.constant dense<0.000000e+00> : vector<8x128xf32>
    %233 = tpu.matmul %230, %232, %cst_100 {dimension_numbers = #tpu.dot_dimension_numbers<[1], [0], [0], [1], [0, 0, 1, 1], [], []>} : vector<8x32xbf16>, vector<32x128xbf16>, vector<8x128xf32> -> vector<8x128xf32>
    %c1_101 = arith.constant 1 : index
    %c0_102 = arith.constant 0 : index
    %c0_103 = arith.constant 0 : index
    %234 = vector.load %arg9[%c1_101, %c0_102, %c0_103] : memref<2x1x128xf32, #tpu.memory_space<vmem>>, vector<1x1x128xf32>
    %235 = vector.shape_cast %234 : vector<1x1x128xf32> to vector<1x128xf32>
    %236 = vector.broadcast %235 : vector<1x128xf32> to vector<8x128xf32>
    %237 = arith.addf %233, %236 : vector<8x128xf32>
    %cst_104 = arith.constant 5.000000e-01 : f32
    %238 = vector.broadcast %cst_104 : f32 to vector<8x128xf32>
    %239 = arith.mulf %238, %237 : vector<8x128xf32>
    %cst_105 = arith.constant 0.707106769 : f32
    %240 = vector.broadcast %cst_105 : f32 to vector<8x128xf32>
    %241 = arith.mulf %237, %240 : vector<8x128xf32>
    %242 = math.absf %241 : vector<8x128xf32>
    %cst_106 = arith.constant 0.327591091 : f32
    %243 = vector.broadcast %cst_106 : f32 to vector<8x128xf32>
    %244 = arith.mulf %243, %242 : vector<8x128xf32>
    %cst_107 = arith.constant 1.000000e+00 : f32
    %245 = vector.broadcast %cst_107 : f32 to vector<8x128xf32>
    %246 = arith.addf %245, %244 : vector<8x128xf32>
    %cst_108 = arith.constant 1.000000e+00 : f32
    %247 = vector.broadcast %cst_108 : f32 to vector<8x128xf32>
    %248 = arith.divf %247, %246 : vector<8x128xf32>
    %cst_109 = arith.constant 1.06140542 : f32
    %249 = vector.broadcast %cst_109 : f32 to vector<8x128xf32>
    %250 = arith.mulf %249, %248 : vector<8x128xf32>
    %cst_110 = arith.constant -1.45315206 : f32
    %251 = vector.broadcast %cst_110 : f32 to vector<8x128xf32>
    %252 = arith.addf %250, %251 : vector<8x128xf32>
    %253 = arith.mulf %252, %248 : vector<8x128xf32>
    %cst_111 = arith.constant 1.42141378 : f32
    %254 = vector.broadcast %cst_111 : f32 to vector<8x128xf32>
    %255 = arith.addf %253, %254 : vector<8x128xf32>
    %256 = arith.mulf %255, %248 : vector<8x128xf32>
    %cst_112 = arith.constant -0.284496725 : f32
    %257 = vector.broadcast %cst_112 : f32 to vector<8x128xf32>
    %258 = arith.addf %256, %257 : vector<8x128xf32>
    %259 = arith.mulf %258, %248 : vector<8x128xf32>
    %cst_113 = arith.constant 0.254829586 : f32
    %260 = vector.broadcast %cst_113 : f32 to vector<8x128xf32>
    %261 = arith.addf %259, %260 : vector<8x128xf32>
    %262 = arith.mulf %261, %248 : vector<8x128xf32>
    %cst_114 = arith.constant 0.000000e+00 : f32
    %263 = vector.broadcast %cst_114 : f32 to vector<8x128xf32>
    %264 = arith.subf %263, %242 : vector<8x128xf32>
    %265 = arith.mulf %264, %242 : vector<8x128xf32>
    %266 = math.exp %265 : vector<8x128xf32>
    %267 = arith.mulf %262, %266 : vector<8x128xf32>
    %cst_115 = arith.constant 1.000000e+00 : f32
    %268 = vector.broadcast %cst_115 : f32 to vector<8x128xf32>
    %269 = arith.subf %268, %267 : vector<8x128xf32>
    %cst_116 = arith.constant 0.000000e+00 : f32
    %270 = vector.broadcast %cst_116 : f32 to vector<8x128xf32>
    %271 = arith.cmpf oge, %241, %270 : vector<8x128xf32>
    %cst_117 = arith.constant 0.000000e+00 : f32
    %272 = vector.broadcast %cst_117 : f32 to vector<8x128xf32>
    %273 = arith.subf %272, %269 : vector<8x128xf32>
    %274 = arith.select %271, %269, %273 : vector<8x128xi1>, vector<8x128xf32>
    %cst_118 = arith.constant 1.000000e+00 : f32
    %275 = vector.broadcast %cst_118 : f32 to vector<8x128xf32>
    %276 = arith.addf %275, %274 : vector<8x128xf32>
    %277 = arith.mulf %239, %276 : vector<8x128xf32>
    %278 = arith.truncf %277 : vector<8x128xf32> to vector<8x128xbf16>
    %c1_119 = arith.constant 1 : index
    %c0_120 = arith.constant 0 : index
    %c0_121 = arith.constant 0 : index
    %279 = vector.load %arg10[%c1_119, %c0_120, %c0_121] : memref<2x128x32xbf16, #tpu.memory_space<vmem>>, vector<1x128x32xbf16>
    %280 = vector.shape_cast %279 : vector<1x128x32xbf16> to vector<128x32xbf16>
    %cst_122 = arith.constant dense<0.000000e+00> : vector<8x32xf32>
    %281 = tpu.matmul %278, %280, %cst_122 {dimension_numbers = #tpu.dot_dimension_numbers<[1], [0], [0], [1], [0, 0, 1, 1], [], []>} : vector<8x128xbf16>, vector<128x32xbf16>, vector<8x32xf32> -> vector<8x32xf32>
    %c1_123 = arith.constant 1 : index
    %c0_124 = arith.constant 0 : index
    %c0_125 = arith.constant 0 : index
    %282 = vector.load %arg11[%c1_123, %c0_124, %c0_125] : memref<2x1x32xf32, #tpu.memory_space<vmem>>, vector<1x1x32xf32>
    %283 = vector.shape_cast %282 : vector<1x1x32xf32> to vector<1x32xf32>
    %284 = vector.broadcast %283 : vector<1x32xf32> to vector<8x32xf32>
    %285 = arith.addf %281, %284 : vector<8x32xf32>
    %286 = arith.addf %285, %229 : vector<8x32xf32>
    %c1_126 = arith.constant 1 : index
    %c0_127 = arith.constant 0 : index
    %c0_128 = arith.constant 0 : index
    %287 = vector.load %arg12[%c1_126, %c0_127, %c0_128] : memref<2x1x32xf32, #tpu.memory_space<vmem>>, vector<1x1x32xf32>
    %288 = vector.shape_cast %287 : vector<1x1x32xf32> to vector<1x32xf32>
    %c1_129 = arith.constant 1 : index
    %c0_130 = arith.constant 0 : index
    %c0_131 = arith.constant 0 : index
    %289 = vector.load %arg13[%c1_129, %c0_130, %c0_131] : memref<2x1x32xf32, #tpu.memory_space<vmem>>, vector<1x1x32xf32>
    %290 = vector.shape_cast %289 : vector<1x1x32xf32> to vector<1x32xf32>
    %cst_132 = arith.constant dense<0.000000e+00> : vector<8xf32>
    %291 = vector.multi_reduction <add>, %286, %cst_132 [1] : vector<8x32xf32> to vector<8xf32>
    %292 = vector.shape_cast %291 : vector<8xf32> to vector<8x1xf32>
    %cst_133 = arith.constant 3.200000e+01 : f32
    %293 = vector.broadcast %cst_133 : f32 to vector<8x1xf32>
    %294 = arith.divf %292, %293 : vector<8x1xf32>
    %295 = arith.mulf %286, %286 : vector<8x32xf32>
    %cst_134 = arith.constant dense<0.000000e+00> : vector<8xf32>
    %296 = vector.multi_reduction <add>, %295, %cst_134 [1] : vector<8x32xf32> to vector<8xf32>
    %297 = vector.shape_cast %296 : vector<8xf32> to vector<8x1xf32>
    %cst_135 = arith.constant 3.200000e+01 : f32
    %298 = vector.broadcast %cst_135 : f32 to vector<8x1xf32>
    %299 = arith.divf %297, %298 : vector<8x1xf32>
    %300 = arith.mulf %294, %294 : vector<8x1xf32>
    %301 = arith.subf %299, %300 : vector<8x1xf32>
    %302 = vector.broadcast %294 : vector<8x1xf32> to vector<8x32xf32>
    %303 = arith.subf %286, %302 : vector<8x32xf32>
    %cst_136 = arith.constant 9.99999974E-6 : f32
    %304 = vector.broadcast %cst_136 : f32 to vector<8x1xf32>
    %305 = arith.addf %301, %304 : vector<8x1xf32>
    %306 = math.rsqrt %305 : vector<8x1xf32>
    %307 = vector.broadcast %306 : vector<8x1xf32> to vector<8x32xf32>
    %308 = arith.mulf %303, %307 : vector<8x32xf32>
    %309 = vector.broadcast %288 : vector<1x32xf32> to vector<8x32xf32>
    %310 = arith.mulf %308, %309 : vector<8x32xf32>
    %311 = vector.broadcast %290 : vector<1x32xf32> to vector<8x32xf32>
    %312 = arith.addf %310, %311 : vector<8x32xf32>
    %c0_137 = arith.constant 0 : index
    %c0_138 = arith.constant 0 : index
    %313 = vector.load %arg14[%c0_137, %c0_138] : memref<8x32xf32, #tpu.memory_space<vmem>>, vector<8x32xf32>
    tpu.vector_store %arg14[%c0_137, %c0_138], %312 {strides = array<i32>} : memref<8x32xf32, #tpu.memory_space<vmem>>, vector<8x32xf32>,
    return
  }
  func.func @transform_0(%arg0: i32) -> (i32, i32) {
    %c0_i32 = arith.constant 0 : i32
    %c0_i32_0 = arith.constant 0 : i32
    return %arg0, %c0_i32 : i32, i32
  }
  func.func @transform_1(%arg0: i32) -> (i32, i32) {
    %c0_i32 = arith.constant 0 : i32
    %c0_i32_0 = arith.constant 0 : i32
    %c0_i32_1 = arith.constant 0 : i32
    return %c0_i32, %c0_i32_0 : i32, i32
  }
  func.func @transform_2(%arg0: i32) -> (i32, i32, i32) {
    %c0_i32 = arith.constant 0 : i32
    %c0_i32_0 = arith.constant 0 : i32
    %c0_i32_1 = arith.constant 0 : i32
    %c0_i32_2 = arith.constant 0 : i32
    return %c0_i32, %c0_i32_0, %c0_i32_1 : i32, i32, i32
  }
  func.func @transform_3(%arg0: i32) -> (i32, i32, i32) {
    %c0_i32 = arith.constant 0 : i32
    %c0_i32_0 = arith.constant 0 : i32
    %c0_i32_1 = arith.constant 0 : i32
    %c0_i32_2 = arith.constant 0 : i32
    return %c0_i32, %c0_i32_0, %c0_i32_1 : i32, i32, i32
  }
  func.func @transform_4(%arg0: i32) -> (i32, i32, i32) {
    %c0_i32 = arith.constant 0 : i32
    %c0_i32_0 = arith.constant 0 : i32
    %c0_i32_1 = arith.constant 0 : i32
    %c0_i32_2 = arith.constant 0 : i32
    return %c0_i32, %c0_i32_0, %c0_i32_1 : i32, i32, i32
  }
  func.func @transform_5(%arg0: i32) -> (i32, i32, i32) {
    %c0_i32 = arith.constant 0 : i32
    %c0_i32_0 = arith.constant 0 : i32
    %c0_i32_1 = arith.constant 0 : i32
    %c0_i32_2 = arith.constant 0 : i32
    return %c0_i32, %c0_i32_0, %c0_i32_1 : i32, i32, i32
  }
  func.func @transform_6(%arg0: i32) -> (i32, i32, i32) {
    %c0_i32 = arith.constant 0 : i32
    %c0_i32_0 = arith.constant 0 : i32
    %c0_i32_1 = arith.constant 0 : i32
    %c0_i32_2 = arith.constant 0 : i32
    return %c0_i32, %c0_i32_0, %c0_i32_1 : i32, i32, i32
  }
  func.func @transform_7(%arg0: i32) -> (i32, i32, i32) {
    %c0_i32 = arith.constant 0 : i32
    %c0_i32_0 = arith.constant 0 : i32
    %c0_i32_1 = arith.constant 0 : i32
    %c0_i32_2 = arith.constant 0 : i32
    return %c0_i32, %c0_i32_0, %c0_i32_1 : i32, i32, i32
  }
  func.func @transform_8(%arg0: i32) -> (i32, i32, i32) {
    %c0_i32 = arith.constant 0 : i32
    %c0_i32_0 = arith.constant 0 : i32
    %c0_i32_1 = arith.constant 0 : i32
    %c0_i32_2 = arith.constant 0 : i32
    return %c0_i32, %c0_i32_0, %c0_i32_1 : i32, i32, i32
  }
  func.func @transform_9(%arg0: i32) -> (i32, i32, i32) {
    %c0_i32 = arith.constant 0 : i32
    %c0_i32_0 = arith.constant 0 : i32
    %c0_i32_1 = arith.constant 0 : i32
    %c0_i32_2 = arith.constant 0 : i32
    return %c0_i32, %c0_i32_0, %c0_i32_1 : i32, i32, i32
  }
  func.func @transform_10(%arg0: i32) -> (i32, i32, i32) {
    %c0_i32 = arith.constant 0 : i32
    %c0_i32_0 = arith.constant 0 : i32
    %c0_i32_1 = arith.constant 0 : i32
    %c0_i32_2 = arith.constant 0 : i32
    return %c0_i32, %c0_i32_0, %c0_i32_1 : i32, i32, i32
  }
  func.func @transform_11(%arg0: i32) -> (i32, i32, i32) {
    %c0_i32 = arith.constant 0 : i32
    %c0_i32_0 = arith.constant 0 : i32
    %c0_i32_1 = arith.constant 0 : i32
    %c0_i32_2 = arith.constant 0 : i32
    return %c0_i32, %c0_i32_0, %c0_i32_1 : i32, i32, i32
  }
  func.func @transform_12(%arg0: i32) -> (i32, i32, i32) {
    %c0_i32 = arith.constant 0 : i32
    %c0_i32_0 = arith.constant 0 : i32
    %c0_i32_1 = arith.constant 0 : i32
    %c0_i32_2 = arith.constant 0 : i32
    return %c0_i32, %c0_i32_0, %c0_i32_1 : i32, i32, i32
  }
  func.func @transform_13(%arg0: i32) -> (i32, i32) {
    %c0_i32 = arith.constant 0 : i32
    %c0_i32_0 = arith.constant 0 : i32
    return %arg0, %c0_i32 : i32, i32
  }
}

</mosaic_0001>

<bundles_post_ra>
// kernel: tpu_custom_call.1
= control target key start
LH: loop header
LB: loop body
LE: loop exit
PB: predicated region body
PF: predicated region fallthrough
CT: control target
= control target key end

     0   :  { %s4873_s0 = inlined_call_operand.vmem [shape: f32[16,32], index: 0, kind: input, shape index: {}]   ;;  %s4874_s1 = inlined_call_operand.vmem [shape: bf16[8,32], index: 1, kind: input, shape index: {}]   ;;  %s4875_s2 = inlined_call_operand.vmem [shape: bf16[2,32,96], index: 2, kind: input, shape index: {}]   ;;  %s4876_s3 = inlined_call_operand.vmem [shape: bf16[2,32,32], index: 3, kind: input, shape index: {}]   ;;  %s4877_s4 = inlined_call_operand.vmem [shape: f32[2,1,32], index: 4, kind: input, shape index: {}]   ;;  %s4878_s5 = inlined_call_operand.vmem [shape: f32[2,1,32], index: 5, kind: input, shape index: {}]   ;;  %s4879_s6 = inlined_call_operand.vmem [shape: f32[2,1,32], index: 6, kind: input, shape index: {}]   ;;  %s4880_s7 = inlined_call_operand.vmem [shape: bf16[2,32,128], index: 7, kind: input, shape index: {}]   ;;  %s4881_s8 = inlined_call_operand.vmem [shape: f32[2,1,128], index: 8, kind: input, shape index: {}]   ;;  %s4882_s9 = inlined_call_operand.vmem [shape: bf16[2,128,32], index: 9, kind: input, shape index: {}]   ;;  %s4883_s10 = inlined_call_operand.vmem [shape: f32[2,1,32], index: 10, kind: input, shape index: {}]   ;;  %s4884_s11 = inlined_call_operand.vmem [shape: f32[2,1,32], index: 11, kind: input, shape index: {}]   ;;  %s4885_s12 = inlined_call_operand.vmem [shape: f32[2,1,32], index: 12, kind: input, shape index: {}]   ;;  %s4886_s13 = inlined_call_operand.hbm [shape: f32[16,32], index: 13, kind: output, shape index: {}]  }
   0x1   :  { %4889 = sst [smem:[#allocation5_spill]] %s4873_s0 }
   0x2   :  { %4890 = sst [smem:[#allocation6_spill]] %s4874_s1 }
   0x3   :  { %4891 = sst [smem:[#allocation7_spill]] %s4875_s2 }
   0x4   :  { %4892 = sst [smem:[#allocation8_spill]] %s4876_s3 }
   0x5   :  { %18 = vsyncpa [#allocation3], 0 }
   0x6   :  { %20 = vsyncpa [#allocation3 + $0x1], 0  ;;  %s4109_s25 = smov 0   ;;  %s4111_s26 = smov 0  }
   0x7   :  { %s4113_s27 = smov 0   ;;  %s4115_s28 = smov 0  }
   0x8 LB: > { %s4130_s29 = sadd.s32 4294967295, %s4030_s28   ;;  %s3305_s30 = sadd.s32 4294967294, %s4030_s28   ;;  %s4030_s28 = sphi %s4115_s28, %s4903_s28   ;;  %s4026_s27 = sphi %s4113_s27, %s4902_s27   ;;  %s4022_s26 = sphi %s4111_s26, %s4901_s26   ;;  %s4018_s25 = sphi %s4109_s25, %s4900_s25  }
   0x9   : > { %s4134_s14 = sadd.s32 1, %s4030_s28   ;;  %s311_s15 = sadd.s32 1, %s4026_s27 }
   0xa   : > { %s308_s16 = ssub.s32 %s4030_s28, %s4134_s14  ;;  %p321_p0 = scmp.ne.s32.totalorder %s4026_s27, %s4022_s26 }
   0xb   : > { %p309_p1 = scmp.eq.s32.totalorder %s308_s16, 0  ;;  %p322_p2 = scmp.eq.s32.totalorder %s4130_s29, 1 }
   0xc   : > { %p327_p3 = scmp.ne.s32.totalorder %s4022_s26, %s4018_s25  ;;  %p328_p4 = scmp.eq.s32.totalorder %s3305_s30, 1 }
   0xd   : > { %s4145_s17 = scalar_select %p309_p1, %s4026_s27, %s311_s15  }
   0xe   : > { %p4147_p5 = por %p322_p2, %p321_p0  ;;  %p4151_p6 = por %p328_p4, %p327_p3 }
   0xf   : > { %p3308_p7 = scmp.ge.s32.totalorder %s4030_s28, 1  ;;  %p389_p8 = scmp.lt.s32.totalorder %s4030_s28, 3 }
  0x11   : > { %p390_p9 = pnand %p3308_p7, %p389_p8 }
  0x12   : > { %s4895_s2 = sld [smem:[#allocation7_spill]] (!%p390_p9)  ;;  %v450_v1 = vlaneseq (!%p390_p9)  ;;  %v4032_v2 = vmov (!%p390_p9), 0.0   ;;  %vm4033_vm0 = vmmov (!%p390_p9), 0   ;;  %p432_p10 = scmp.lt.s32.totalorder (!%p390_p9), %s4130_s29, 1  ;;  %v4034_v5 = vmov (!%p390_p9), 1966171168  }
  0x13   : > { %393 = sbr.rel (%p390_p9) target bundleno = 4450 (0x1162), region = 72  ;;  %3535 = vmatprep.subr.bf16.mxu1 (!%p390_p9), %v4032_v2  ;;  %3561 = vmatprep.subr.bf16.mxu0 (!%p390_p9), %v4032_v2  ;;  %s4896_s1 = sld [smem:[#allocation6_spill]] (!%p390_p9)  ;;  %v448_v6 = vunpack.c.l.s4 (!%p390_p9), %v4034_v5  ;;  %vm489_vm1 = vcmask (!%p390_p9), 261120   ;;  %vm1081_vm2 = vcmask (!%p390_p9), 64512   ;;  %vm1184_vm3 = vcmask (!%p390_p9), 1043456  }
  0x14   : > { %3539 = vmatprep.mubr.msk.bf16.mxu1 (!%p390_p9), %vm4033_vm0, %v4032_v2  ;;  %3563 = vmatprep.mubr.msk.bf16.mxu0 (!%p390_p9), %vm4033_vm0, %v4032_v2  ;;  %v451_v7 = vshrl.u32 (!%p390_p9), %v450_v1, 7  ;;  %s4897_s0 = sld [smem:[#allocation5_spill]] (!%p390_p9)  ;;  %s4035_s23 = smov (!%p390_p9), 32  }
  0x15   : > { %v449_v8 = vunpack.c.0.s8 (!%p390_p9), %v448_v6  ;;  %s4036_s24 = smov (!%p390_p9), 96   ;;  %s4887_s30 = smov (!%p390_p9), 64  }
  0x16   : > { %v544_v12 = vsub.s32 (!%p390_p9), 0, %v451_v7  ;;  %s4898_s3 = sld [smem:[#allocation8_spill]] (!%p390_p9)  ;;  %s4899_s20 = smov (!%p390_p9), 64  }
  0x17   : > { %v452_v11 = vsub.s32 (!%p390_p9), %v449_v8, %v451_v7 }
  0x18   : > { %v3860_v0 = vld [vmem:[%s4895_s2] sm:$0xff] (!%p390_p9)   ;;  %v3861_v3 = vld [vmem:[%s4895_s2 + $0x8] sm:$0xff] (!%p390_p9)  }
  0x19   : > { %3536 = vmatpush3.bf16.msra.mxu1 (!%p390_p9), %v3860_v0  ;;  %v3311_v4 = vld.sshfl [vmem:[%s4896_s1] sm:$0x33 pattern:$0x75316420] (!%p390_p9) }
  0x1a   : > { %3537 = vmatprep.subr.bf16.mxu1 %v4032_v2  ;;  %s433_s15 = scalar_select %p432_p10, %s4130_s29, 1  ;;  %v446_v9 = vcombine.high %v3311_v4, %v3311_v4  ;;  %v453_v14 = vrot.slane %v3311_v4, %v452_v11 }
  0x1c   : > { %s3310_s16 = sshll.u32 %s433_s15, 3  ;;  %v460_v15 = vrot.slane %v446_v9, %v452_v11  ;;  %v3315_v16 = vpack.i.b16 %v453_v14, %v453_v14  ;;  %v464_v18 = vunpack.i.h.s16 %v453_v14  ;;  %v461_v20 = vcombine.high %v453_v14, %v453_v14 }
  0x1d   : > { %3538 = vmatpush3.bf16.msra.mxu1 %v3861_v3  ;;  %s435_s22 = scalar_lea.vmem %s4897_s0, %s3310_s16 }
  0x1e   : > { %3543 = vmatprep.subr.bf16.mxu1 %v4032_v2  ;;  %v4179_v10 = vld [vmem:[%s435_s22] sm:$0xff]  ;;  %v3316_v17 = vpack.i.b16 %v460_v15, %v460_v15  ;;  %v466_v19 = vunpack.i.h.s16 %v460_v15  ;;  %v462_v21 = vcombine.high %v460_v15, %v460_v15  ;;  %v545_v22 = vrot.slane %v3315_v16, %v544_v12  ;;  %s429_s22 = sand.u32 1, %s4022_s26  }
  0x1f   : > { %v472_v13 = vpack.c.bf16 %v4179_v10, %v4179_v10  ;;  %v535_v24 = vpack.i.b16 %v464_v18, %v464_v18  ;;  %v3317_v26 = vpack.i.b16 %v461_v20, %v461_v20  ;;  %v468_v27 = vunpack.i.h.s16 %v461_v20  ;;  %s3233_s15 = scalar_lea.sflag [#allocation3], %s429_s22 }
  0x20   : > { %v553_v23 = vrot.slane %v3316_v17, %v544_v12  ;;  %v537_v25 = vpack.i.b16 %v466_v19, %v466_v19  ;;  %v3318_v28 = vpack.i.b16 %v462_v21, %v462_v21  ;;  %v470_v29 = vunpack.i.h.s16 %v462_v21 }
  0x21   : > { %3540 = vmatmul.mubr.msk.bf16.vlgmr.msra.gmra.mrb[0].mxu1 %vm489_vm1, %v472_v13  ;;  %v575_v30 = vpack.i.b16 %v545_v22, %v545_v22  ;;  %v549_v32 = vrot.slane %v535_v24, %v544_v12  ;;  %v561_v34 = vrot.slane %v3317_v26, %v544_v12  ;;  %v539_v35 = vpack.i.b16 %v468_v27, %v468_v27 }
  0x22   : > { %3545 = vmatprep.mubr.msk.bf16.mxu1 %vm4033_vm0, %v4032_v2  ;;  %v589_v31 = vpack.i.b16 %v553_v23, %v553_v23  ;;  %v557_v33 = vrot.slane %v537_v25, %v544_v12  ;;  %v541_v36 = vpack.i.b16 %v470_v29, %v470_v29  ;;  %v569_v43 = vrot.slane %v3318_v28, %v544_v12 }
  0x23   : > { %v580_v37 = vrot.slane %v575_v30, %v544_v12  ;;  %v582_v39 = vpack.i.b16 %v549_v32, %v549_v32  ;;  %v603_v41 = vpack.i.b16 %v561_v34, %v561_v34  ;;  %v565_v42 = vrot.slane %v539_v35, %v544_v12 }
  0x24   : > { %v594_v38 = vrot.slane %v589_v31, %v544_v12  ;;  %v596_v40 = vpack.i.b16 %v557_v33, %v557_v33  ;;  %v573_v46 = vrot.slane %v541_v36, %v544_v12  ;;  %v617_v48 = vpack.i.b16 %v569_v43, %v569_v43 }
  0x25   : > { %638 = vrot.lane.b32.xlu0 %v580_v37, %s4035_s23  ;;  %v587_v44 = vrot.slane %v582_v39, %v544_v12  ;;  %v610_v47 = vpack.i.b16 %v565_v42, %v565_v42  ;;  %v608_v49 = vrot.slane %v603_v41, %v544_v12 }
  0x26   : > { %642 = vrot.lane.b32.xlu1 %v594_v38, %s4035_s23  ;;  %v601_v45 = vrot.slane %v596_v40, %v544_v12  ;;  %v624_v51 = vpack.i.b16 %v573_v46, %v573_v46  ;;  %v4186_v52 = vrot.slane %v617_v48, %v544_v12 }
  0x27   : > { %v615_v50 = vrot.slane %v610_v47, %v544_v12 }
  0x28   : > { %v4188_v53 = vrot.slane %v624_v51, %v544_v12 }
  0x29   : > { %640 = vrot.lane.b32.xlu0 %v587_v44, %s4035_s23 }
  0x2a   : > { %644 = vrot.lane.b32.xlu1 %v601_v45, %s4035_s23 }
  0x2d   : > { %646 = vrot.lane.b32.xlu0 %v608_v49, %s4035_s23 }
  0x2e   : > { %648 = vrot.lane.b32.xlu1 %v615_v50, %s4035_s23 }
  0x31   : > { %650 = vrot.lane.b32.xlu0 %v4186_v52, %s4035_s23 }
  0x32   : > { %652 = vrot.lane.b32.xlu1 %v4188_v53, %s4035_s23  ;;  %s3309_s23 = sshll.u32 %s429_s22, 3 }
  0x33   : > { %s431_s21 = scalar_lea.vmem [#allocation2], %s3309_s23 }
  0x34   : > { %s3246_s0 = sshll.u32 %s431_s21, 4  ;;  %s4832_s0 = int_to_ptr.vmem [resolvable:$true] %s3246_s0 }
  0x35   : > { %s3968_s16 = scalar_lea.vmem %s4832_s0, 128 }
  0x36   : > { %p3969_p11 = scmp.ne.s32.totalorder %s4832_s0, %s3968_s16 }
  0x38   : > { %p3970_p12 = pnand %p3969_p11, %p4147_p5 }
  0x3a   : > { %p3971_p13 = pneg %p3970_p12 }
  0x97   : > { %v4192_v54 = vpop.permute.xlu0 %638 }
  0x98   : > { %v4194_v55 = vpop.permute.xlu1 %642 }
  0x9b   : > { %v4196_v56 = vpop.permute.xlu0 %640 }
  0x9c   : > { %v4198_v57 = vpop.permute.xlu1 %644 }
  0x9f   : > { %v4208_v1 = vpop.permute.xlu0 %646 }
  0xa0   : > { %v4210_v3 = vpop.permute.xlu1 %648 }
  0xa3   : > { %v4222_v8 = vpop.permute.xlu0 %650 }
  0xa4   : > { %v4224_v9 = vpop.permute.xlu1 %652 }
  0xf4   : > { %v527_v58 = vpop.f32.mrb[0].mxu1 }
  0xf5   : > { %v4200_v59 = vpack.c.bf16 %v527_v58, %v527_v58  ;;  %v3541_v60 = vpop.f32.mrb[1].mxu1 }
  0xf6   : > { %v530_v61 = vpop.f32.mrb[2].mxu1 }
  0xf7   : > { %v3542_v62 = vpop.f32.mrb[3].mxu1  ;;  %v663_v63 = vmul.bf16 %v4196_v56, %v4200_v59  ;;  %v662_v0 = vmul.bf16 %v4192_v54, %v4200_v59  ;;  %v665_v4 = vmul.bf16 %v4198_v57, %v4200_v59  ;;  %v664_v5 = vmul.bf16 %v4194_v55, %v4200_v59 }
  0xf8   : > { %v667_v6 = vmul.bf16 %v4210_v3, %v4200_v59  ;;  %v666_v7 = vmul.bf16 %v4208_v1, %v4200_v59  ;;  %v668_v11 = vmul.bf16 %v4222_v8, %v4200_v59  ;;  %v669_v12 = vmul.bf16 %v4224_v9, %v4200_v59 }
  0xf9   : > { %752 = vrot.lane.b32.xlu1 %v663_v63, %s4036_s24  ;;  %703 = vrot.lane.b32.xlu0 %v662_v0, %s4036_s24 }
  0xfd   : > { %844 = vrot.lane.b32.xlu1 %v665_v4, %s4036_s24  ;;  %798 = vrot.lane.b32.xlu0 %v664_v5, %s4036_s24 }
 0x101   : > { %936 = vrot.lane.b32.xlu1 %v667_v6, %s4036_s24  ;;  %890 = vrot.lane.b32.xlu0 %v666_v7, %s4036_s24 }
 0x105   : > { %1028 = vrot.lane.b32.xlu1 %v669_v12, %s4036_s24  ;;  %982 = vrot.lane.b32.xlu0 %v668_v11, %s4036_s24 }
 0x109   : > { %670 = vrot.lane.b32.xlu1 %v580_v37, %s4887_s30  ;;  %672 = vrot.lane.b32.xlu0 %v587_v44, %s4887_s30 }
 0x10d   : > { %674 = vrot.lane.b32.xlu1 %v594_v38, %s4887_s30  ;;  %678 = vrot.lane.b32.xlu0 %v608_v49, %s4887_s30 }
 0x111   : > { %676 = vrot.lane.b32.xlu1 %v601_v45, %s4887_s30 }
 0x115   : > { %680 = vrot.lane.b32.xlu1 %v615_v50, %s4887_s30 }
 0x16b   : > { %v753_v13 = vpop.permute.xlu1 %752  ;;  %v704_v14 = vpop.permute.xlu0 %703 }
 0x16c   : > { %v709_v15 = vsel %vm489_vm1, %v704_v14, 0  ;;  %v755_v18 = vsel %vm489_vm1, %v753_v13, 0 }
 0x16d   : > { %3544 = vmatpush3.bf16.xpose.msra.mxu1 %v709_v15 }
 0x16e   : > { %3549 = vmatprep.subr.bf16.mxu1 %v4032_v2 }
 0x16f   : > { %v845_v16 = vpop.permute.xlu1 %844  ;;  %v799_v21 = vpop.permute.xlu0 %798 }
 0x170   : > { %v847_v17 = vsel %vm489_vm1, %v845_v16, 0  ;;  %v801_v22 = vsel %vm489_vm1, %v799_v21, 0 }
 0x171   : > { %3562 = vmatpush3.bf16.xpose.msra.mxu0 %v847_v17 }
 0x172   : > { %3573 = vmatprep.subr.bf16.mxu0 %v4032_v2 }
 0x173   : > { %v937_v19 = vpop.permute.xlu1 %936  ;;  %v891_v25 = vpop.permute.xlu0 %890 }
 0x174   : > { %3546 = vmatmul.mubr.msk.bf16.vlgmr.msra.gmra.mrb[4].mxu1 %vm489_vm1, %v4200_v59  ;;  %v939_v20 = vsel %vm489_vm1, %v937_v19, 0  ;;  %v893_v26 = vsel %vm489_vm1, %v891_v25, 0 }
 0x175   : > { %3550 = vmatpush3.bf16.xpose.msra.mxu1 %v755_v18  ;;  %3551 = vmatprep.mubr.msk.bf16.mxu1 %vm4033_vm0, %v4032_v2 }
 0x176   : > { %3555 = vmatprep.subr.bf16.mxu1 %v4032_v2 }
 0x177   : > { %v1029_v23 = vpop.permute.xlu1 %1028  ;;  %v983_v27 = vpop.permute.xlu0 %982 }
 0x178   : > { %3564 = vmatmul.mubr.msk.bf16.vlgmr.msra.gmra.mrb[0].mxu0 %vm489_vm1, %v4200_v59  ;;  %v1031_v24 = vsel %vm489_vm1, %v1029_v23, 0  ;;  %v985_v28 = vsel %vm489_vm1, %v983_v27, 0 }
 0x179   : > { %3574 = vmatpush3.bf16.xpose.msra.mxu0 %v939_v20  ;;  %3575 = vmatprep.mubr.msk.bf16.mxu0 %vm4033_vm0, %v4032_v2 }
 0x17a   : > { %3585 = vmatprep.subr.bf16.mxu0 %v4032_v2 }
 0x17b   : > { %v4318_v25 = vpop.permute.xlu0 %672 }
 0x17c   : > { %3552 = vmatmul.mubr.msk.bf16.vlgmr.msra.gmra.mrb[8].mxu1 %vm489_vm1, %v4200_v59 }
 0x17d   : > { %3556 = vmatpush3.bf16.xpose.msra.mxu1 %v801_v22  ;;  %3557 = vmatprep.mubr.msk.bf16.mxu1 %vm4033_vm0, %v4032_v2 }
 0x17e   : > { %3567 = vmatprep.subr.bf16.mxu1 %v4032_v2 }
 0x180   : > { %3576 = vmatmul.mubr.msk.bf16.vlgmr.msra.gmra.mrb[4].mxu0 %vm489_vm1, %v4200_v59 }
 0x181   : > { %3586 = vmatpush3.bf16.xpose.msra.mxu0 %v1031_v24  ;;  %3587 = vmatprep.mubr.msk.bf16.mxu0 %vm4033_vm0, %v4032_v2 }
 0x182   : > { %3597 = vmatprep.subr.bf16.mxu0 %v4032_v2 }
 0x184   : > { %3558 = vmatmul.mubr.msk.bf16.vlgmr.msra.gmra.mrb[12].mxu1 %vm489_vm1, %v4200_v59 }
 0x185   : > { %3568 = vmatpush3.bf16.xpose.msra.mxu1 %v893_v26  ;;  %3569 = vmatprep.mubr.msk.bf16.mxu1 %vm4033_vm0, %v4032_v2  ;;  %v4323_v26 = vpop.permute.xlu1 %670 }
 0x186   : > { %3579 = vmatprep.subr.bf16.mxu1 %v4032_v2  ;;  %v694_v27 = vmul.bf16 %v4323_v26, %v4200_v59 }
 0x188   : > { %3588 = vmatmul.mubr.msk.bf16.vlgmr.msra.gmra.mrb[8].mxu0 %vm489_vm1, %v4200_v59 }
 0x189   : > { %3599 = vmatprep.mubr.msk.bf16.mxu0 %vm4033_vm0, %v4032_v2 }
 0x18c   : > { %3570 = vmatmul.mubr.msk.bf16.vlgmr.msra.gmra.mrb[16].mxu1 %vm489_vm1, %v4200_v59 }
 0x18d   : > { %3580 = vmatpush3.bf16.xpose.msra.mxu1 %v985_v28  ;;  %3581 = vmatprep.mubr.msk.bf16.mxu1 %vm4033_vm0, %v4032_v2  ;;  %v4328_v28 = vpop.permute.xlu1 %674 }
 0x18e   : > { %3591 = vmatprep.subr.bf16.mxu1 %v4032_v2 }
 0x194   : > { %3582 = vmatmul.mubr.msk.bf16.vlgmr.msra.gmra.mrb[20].mxu1 %vm489_vm1, %v4200_v59 }
 0x195   : > { %3593 = vmatprep.mubr.msk.bf16.mxu1 %vm4033_vm0, %v4032_v2 }
 0x247   : > { %v745_v29 = vpop.f32.mrb[4].mxu1 }
 0x248   : > { %v4288_v30 = vmul.f32 0.17677669, %v745_v29  ;;  %v3547_v31 = vpop.f32.mrb[5].mxu1  ;;  %v4330_v29 = vpop.permute.xlu0 %678 }
 0x249   : > { %v748_v32 = vpop.f32.mrb[6].mxu1  ;;  %v4332_v31 = vpop.permute.xlu1 %676 }
 0x24a   : > { %v3548_v33 = vpop.f32.mrb[7].mxu1  ;;  %v1082_v34 = vsel %vm1081_vm2, %v4288_v30, -inf }
 0x24b   : > { %v883_v35 = vpop.f32.mrb[0].mxu0  ;;  %1083 = vmax.xlane.f32.xlu0 %v1082_v34 }
 0x24c   : > { %v4292_v36 = vmul.f32 0.17677669, %v883_v35  ;;  %v3565_v37 = vpop.f32.mrb[1].mxu0 }
 0x24d   : > { %v886_v38 = vpop.f32.mrb[2].mxu0  ;;  %v4335_v35 = vpop.permute.xlu1 %680 }
 0x24e   : > { %v3566_v39 = vpop.f32.mrb[3].mxu0  ;;  %v1091_v40 = vsel %vm1081_vm2, %v4292_v36, -inf }
 0x24f   : > { %1092 = vmax.xlane.f32.xlu0 %v1091_v40  ;;  %v791_v41 = vpop.f32.mrb[8].mxu1 }
 0x250   : > { %v4296_v42 = vmul.f32 0.17677669, %v791_v41  ;;  %v3553_v43 = vpop.f32.mrb[9].mxu1 }
 0x251   : > { %v794_v44 = vpop.f32.mrb[10].mxu1 }
 0x252   : > { %v3554_v45 = vpop.f32.mrb[11].mxu1  ;;  %v1085_v46 = vsel %vm1081_vm2, %v4296_v42, -inf }
 0x253   : > { %v975_v47 = vpop.f32.mrb[4].mxu0  ;;  %1086 = vmax.xlane.f32.xlu1 %v1085_v46 }
 0x254   : > { %v1078_v48 = vmul.f32 0.17677669, %v975_v47  ;;  %v3577_v49 = vpop.f32.mrb[5].mxu0 }
 0x255   : > { %v978_v50 = vpop.f32.mrb[6].mxu0 }
 0x256   : > { %v3578_v51 = vpop.f32.mrb[7].mxu0  ;;  %v1097_v58 = vsel %vm1081_vm2, %v1078_v48, -inf }
 0x257   : > { %1098 = vmax.xlane.f32.xlu0 %v1097_v58  ;;  %v837_v60 = vpop.f32.mrb[12].mxu1 }
 0x258   : > { %v1075_v61 = vmul.f32 0.17677669, %v837_v60  ;;  %v3559_v62 = vpop.f32.mrb[13].mxu1 }
 0x259   : > { %v840_v63 = vpop.f32.mrb[14].mxu1 }
 0x25a   : > { %v3560_v0 = vpop.f32.mrb[15].mxu1  ;;  %v1088_v4 = vsel %vm1081_vm2, %v1075_v61, -inf }
 0x25b   : > { %v1067_v5 = vpop.f32.mrb[8].mxu0  ;;  %1089 = vmax.xlane.f32.xlu0 %v1088_v4  ;;  %v697_v0 = vmul.bf16 %v4332_v31, %v4200_v59  ;;  %v699_v4 = vmul.bf16 %v4335_v35, %v4200_v59 }
 0x25c   : > { %v3589_v6 = vpop.f32.mrb[9].mxu0  ;;  %v4312_v23 = vmul.f32 0.17677669, %v1067_v5  ;;  %v696_v5 = vmul.bf16 %v4328_v28, %v4200_v59 }
 0x25d   : > { %v1070_v7 = vpop.f32.mrb[10].mxu0  ;;  %v698_v6 = vmul.bf16 %v4330_v29, %v4200_v59 }
 0x25e   : > { %v3590_v11 = vpop.f32.mrb[11].mxu0  ;;  %v1103_v24 = vsel %vm1081_vm2, %v4312_v23, -inf }
 0x25f   : > { %v929_v12 = vpop.f32.mrb[16].mxu1 }
 0x260   : > { %v3571_v13 = vpop.f32.mrb[17].mxu1  ;;  %v4306_v20 = vmul.f32 0.17677669, %v929_v12 }
 0x261   : > { %v932_v14 = vpop.f32.mrb[18].mxu1 }
 0x262   : > { %v3572_v15 = vpop.f32.mrb[19].mxu1  ;;  %v1094_v22 = vsel %vm1081_vm2, %v4306_v20, -inf }
 0x264   : > { %684 = vrot.lane.b32.xlu1 %v4188_v53, %s4887_s30 }
 0x267   : > { %v1021_v16 = vpop.f32.mrb[20].mxu1 }
 0x268   : > { %v3583_v17 = vpop.f32.mrb[21].mxu1  ;;  %v4308_v21 = vmul.f32 0.17677669, %v1021_v16 }
 0x269   : > { %v1024_v18 = vpop.f32.mrb[22].mxu1 }
 0x26a   : > { %v3584_v19 = vpop.f32.mrb[23].mxu1  ;;  %v1100_v53 = vsel %vm1081_vm2, %v4308_v21, -inf }
 0x271   : > { %682 = vrot.lane.b32.xlu0 %v4186_v52, %s4887_s30  ;;  %v695_v52 = vmul.bf16 %v4318_v25, %v4200_v59 }
 0x288   : > { %1095 = vmax.xlane.f32.xlu1 %v1094_v22 }
 0x28c   : > { %1101 = vmax.xlane.f32.xlu1 %v1100_v53 }
 0x290   : > { %1104 = vmax.xlane.f32.xlu0 %v1103_v24 }
 0x29d   : > { %1229 = vrot.lane.b32.xlu1 %v695_v52, %s4887_s30 }
 0x2a6   : > { %1179 = vrot.lane.b32.xlu0 %v694_v27, %s4887_s30 }
 0x2d8   : > { %v1084_v32 = vpop.xlane.xlu0 %1083 }
 0x2d9   : > { %v1106_v33 = vsub.f32 %v4288_v30, %v1084_v32 }
 0x2db   : > { %v1114_v34 = vmul.f32 1.442695, %v1106_v33 }
 0x2dc   : > { %v1093_v37 = vpop.xlane.xlu0 %1092 }
 0x2dd   : > { %3888 = vpow2.f32 %v1114_v34  ;;  %v1109_v38 = vsub.f32 %v4292_v36, %v1093_v37 }
 0x2df   : > { %v1120_v39 = vmul.f32 1.442695, %v1109_v38 }
 0x2e0   : > { %v1087_v40 = vpop.xlane.xlu1 %1086 }
 0x2e1   : > { %3890 = vpow2.f32 %v1120_v39  ;;  %v1107_v41 = vsub.f32 %v4296_v42, %v1087_v40 }
 0x2e3   : > { %v1116_v43 = vmul.f32 1.442695, %v1107_v41 }
 0x2e4   : > { %v1099_v44 = vpop.xlane.xlu0 %1098  ;;  %v4370_v7 = vpop.permute.xlu1 %684 }
 0x2e5   : > { %3892 = vpow2.f32 %v1116_v43  ;;  %v1111_v45 = vsub.f32 %v1078_v48, %v1099_v44  ;;  %v701_v38 = vmul.bf16 %v4370_v7, %v4200_v59 }
 0x2e7   : > { %v4339_v46 = vpop.eup %3888  ;;  %v1124_v47 = vmul.f32 1.442695, %v1111_v45 }
 0x2e8   : > { %v1090_v30 = vpop.xlane.xlu0 %1089  ;;  %v1130_v49 = vsel %vm1081_vm2, %v4339_v46, 0.0 }
 0x2e9   : > { %3894 = vpow2.f32 %v1124_v47  ;;  %v1108_v50 = vsub.f32 %v1075_v61, %v1090_v30  ;;  %1131 = vadd.xlane.f32.xlu0 %v1130_v49 }
 0x2eb   : > { %v4343_v36 = vpop.eup %3890  ;;  %v1118_v51 = vmul.f32 1.442695, %v1108_v50 }
 0x2ec   : > { %v1139_v42 = vsel %vm1081_vm2, %v4343_v36, 0.0  ;;  %v4372_v11 = vpop.permute.xlu0 %682 }
 0x2ed   : > { %3896 = vpow2.f32 %v1118_v51  ;;  %1140 = vadd.xlane.f32.xlu0 %v1139_v42  ;;  %v700_v12 = vmul.bf16 %v4372_v11, %v4200_v59 }
 0x2ef   : > { %v4347_v58 = vpop.eup %3892 }
 0x2f0   : > { %v1133_v48 = vsel %vm1081_vm2, %v4347_v58, 0.0 }
 0x2f1   : > { %1134 = vadd.xlane.f32.xlu1 %v1133_v48 }
 0x2f3   : > { %v4351_v60 = vpop.eup %3894 }
 0x2f4   : > { %v1145_v61 = vsel %vm1081_vm2, %v4351_v60, 0.0 }
 0x2f5   : > { %1146 = vadd.xlane.f32.xlu0 %v1145_v61 }
 0x2f7   : > { %v4355_v62 = vpop.eup %3896 }
 0x2f8   : > { %v1136_v63 = vsel %vm1081_vm2, %v4355_v62, 0.0 }
 0x2f9   : > { %1137 = vadd.xlane.f32.xlu0 %v1136_v63 }
 0x302   : > { %1327 = vrot.lane.b32.xlu1 %v697_v0, %s4887_s30 }
 0x306   : > { %1425 = vrot.lane.b32.xlu1 %v699_v4, %s4887_s30 }
 0x30f   : > { %1278 = vrot.lane.b32.xlu0 %v696_v5, %s4887_s30 }
 0x313   : > { %1376 = vrot.lane.b32.xlu0 %v698_v6, %s4887_s30 }
 0x315   : > { %v1096_v13 = vpop.xlane.xlu1 %1095 }
 0x316   : > { %v1110_v15 = vsub.f32 %v4306_v20, %v1096_v13 }
 0x317   : > { %1474 = vrot.lane.b32.xlu0 %v700_v12, %s4887_s30 }
 0x318   : > { %v1122_v22 = vmul.f32 1.442695, %v1110_v15 }
 0x319   : > { %v1102_v14 = vpop.xlane.xlu1 %1101 }
 0x31a   : > { %v1112_v53 = vsub.f32 %v4308_v21, %v1102_v14 }
 0x31c   : > { %v1126_v20 = vmul.f32 1.442695, %v1112_v53 }
 0x31d   : > { %v1105_v16 = vpop.xlane.xlu0 %1104  ;;  %v1230_v17 = vpop.permute.xlu1 %1229 }
 0x31e   : > { %v1113_v18 = vsub.f32 %v4312_v23, %v1105_v16  ;;  %v1235_v19 = vsel %vm1184_vm3, %v1230_v17, 0 }
 0x31f   : > { %3598 = vmatpush3.bf16.msra.mxu0 %v1235_v19 }
 0x320   : > { %v1128_v24 = vmul.f32 1.442695, %v1113_v18  ;;  %3609 = vmatprep.subr.bf16.mxu0 %v4032_v2 }
 0x321   : > { %v1180_v52 = vpop.permute.xlu0 %1179 }
 0x322   : > { %3898 = vpow2.f32 %v1128_v24  ;;  %v1186_v27 = vsel %vm1184_vm3, %v1180_v52, 0 }
 0x323   : > { %3592 = vmatpush3.bf16.msra.mxu1 %v1186_v27  ;;  %3900 = vpow2.f32 %v1122_v22 }
 0x324   : > { %3603 = vmatprep.subr.bf16.mxu1 %v4032_v2  ;;  %3902 = vpow2.f32 %v1126_v20 }
 0x32c   : > { %v4385_v23 = vpop.eup %3898 }
 0x32d   : > { %v1151_v32 = vsel %vm1081_vm2, %v4385_v23, 0.0  ;;  %v4389_v33 = vpop.eup %3900 }
 0x32e   : > { %1152 = vadd.xlane.f32.xlu1 %v1151_v32  ;;  %v1142_v21 = vsel %vm1081_vm2, %v4389_v33, 0.0  ;;  %v4393_v34 = vpop.eup %3902 }
 0x32f   : > { %v1148_v37 = vsel %vm1081_vm2, %v4393_v34, 0.0 }
 0x332   : > { %1143 = vadd.xlane.f32.xlu1 %v1142_v21 }
 0x336   : > { %1149 = vadd.xlane.f32.xlu1 %v1148_v37 }
 0x347   : > { %1523 = vrot.lane.b32.xlu1 %v701_v38, %s4887_s30  ;;  %v3862_v38 = vld [vmem:[%s4898_s3] sm:$0xff]  }
 0x376   : > { %v1132_v39 = vpop.xlane.xlu0 %1131 }
 0x377   : > { %3904 = vrcp.f32 %v1132_v39  ;;  %v3863_v39 = vld [vmem:[%s4898_s3 + $0x8] sm:$0xff]  }
 0x37a   : > { %v1141_v40 = vpop.xlane.xlu0 %1140 }
 0x37e   : > { %v1135_v41 = vpop.xlane.xlu1 %1134 }
 0x37f   : > { %3906 = vrcp.f32 %v1135_v41 }
 0x380   : > { %3908 = vrcp.f32 %v1141_v40 }
 0x381   : > { %v3905_v43 = vpop.eup %3904 }
 0x382   : > { %v1162_v44 = vmul.f32 %v3905_v43, %v4339_v46  ;;  %v1147_v45 = vpop.xlane.xlu0 %1146  ;;  %v1328_v51 = vpop.permute.xlu1 %1327 }
 0x383   : > { %v1333_v61 = vsel %vm1184_vm3, %v1328_v51, 0 }
 0x384   : > { %v1170_v47 = vpack.c.bf16 %v1162_v44, %v1162_v44 }
 0x386   : > { %3594 = vmatmul.mubr.msk.bf16.vlgmr.msra.gmra.mrb[24].mxu1 %vm1081_vm2, %v1170_v47  ;;  %v1138_v30 = vpop.xlane.xlu0 %1137  ;;  %v1426_v4 = vpop.permute.xlu1 %1425 }
 0x387   : > { %3910 = vrcp.f32 %v1138_v30  ;;  %3605 = vmatprep.mubr.msk.bf16.mxu1 %vm4033_vm0, %v4032_v2  ;;  %v1431_v14 = vsel %vm1184_vm3, %v1426_v4, 0 }
 0x388   : > { %3912 = vrcp.f32 %v1147_v45 }
 0x389   : > { %v3907_v59 = vpop.eup %3906 }
 0x38a   : > { %v1163_v49 = vmul.f32 %v3907_v59, %v4347_v58  ;;  %v1279_v50 = vpop.permute.xlu0 %1278  ;;  %v3909_v48 = vpop.eup %3908 }
 0x38b   : > { %v1284_v42 = vsel %vm1184_vm3, %v1279_v50, 0  ;;  %v1165_v58 = vmul.f32 %v3909_v48, %v4343_v36 }
 0x38c   : > { %3604 = vmatpush3.bf16.msra.mxu1 %v1284_v42  ;;  %v1171_v46 = vpack.c.bf16 %v1163_v49, %v1163_v49 }
 0x38d   : > { %3615 = vmatprep.subr.bf16.mxu1 %v4032_v2  ;;  %v1173_v12 = vpack.c.bf16 %v1165_v58, %v1165_v58 }
 0x38e   : > { %3600 = vmatmul.mubr.msk.bf16.vlgmr.msra.gmra.mrb[12].mxu0 %vm1081_vm2, %v1171_v46  ;;  %v1377_v5 = vpop.permute.xlu0 %1376 }
 0x38f   : > { %3610 = vmatpush3.bf16.msra.mxu0 %v1333_v61  ;;  %3611 = vmatprep.mubr.msk.bf16.mxu0 %vm4033_vm0, %v4032_v2  ;;  %v1382_v15 = vsel %vm1184_vm3, %v1377_v5, 0 }
 0x390   : > { %3621 = vmatprep.subr.bf16.mxu0 %v4032_v2 }
 0x391   : > { %v3911_v63 = vpop.eup %3910 }
 0x392   : > { %v1164_v0 = vmul.f32 %v3911_v63, %v4355_v62  ;;  %v3913_v13 = vpop.eup %3912  ;;  %v1475_v20 = vpop.permute.xlu0 %1474 }
 0x393   : > { %v1167_v36 = vmul.f32 %v3913_v13, %v4351_v60 }
 0x394   : > { %v1172_v6 = vpack.c.bf16 %v1164_v0, %v1164_v0 }
 0x395   : > { %v1175_v62 = vpack.c.bf16 %v1167_v36, %v1167_v36 }
 0x396   : > { %3606 = vmatmul.mubr.msk.bf16.vlgmr.msra.gmra.mrb[28].mxu1 %vm1081_vm2, %v1172_v6  ;;  %3612 = vmatmul.mubr.msk.bf16.vlgmr.msra.gmra.mrb[16].mxu0 %vm1081_vm2, %v1173_v12 }
 0x397   : > { %3616 = vmatpush3.bf16.msra.mxu1 %v1382_v15  ;;  %3622 = vmatpush3.bf16.msra.mxu0 %v1431_v14 }
 0x398   : > { %3623 = vmatprep.mubr.msk.bf16.mxu0 %vm4033_vm0, %v4032_v2  ;;  %3633 = vmatprep.subr.bf16.mxu0 %v4032_v2 }
 0x399   : > { %3617 = vmatprep.mubr.msk.bf16.mxu1 %vm4033_vm0, %v4032_v2  ;;  %3627 = vmatprep.subr.bf16.mxu1 %v4032_v2 }
 0x39e   : > { %3624 = vmatmul.mubr.msk.bf16.vlgmr.msra.gmra.mrb[20].mxu0 %vm1081_vm2, %v1175_v62 }
 0x39f   : > { %3635 = vmatprep.mubr.msk.bf16.mxu0 %vm4033_vm0, %v4032_v2 }
 0x3bb   : > { %v1153_v16 = vpop.xlane.xlu1 %1152 }
 0x3bc   : > { %3914 = vrcp.f32 %v1153_v16 }
 0x3bf   : > { %v1144_v17 = vpop.xlane.xlu1 %1143 }
 0x3c0   : > { %3916 = vrcp.f32 %v1144_v17 }
 0x3c3   : > { %v1150_v60 = vpop.xlane.xlu1 %1149 }
 0x3c4   : > { %3918 = vrcp.f32 %v1150_v60 }
 0x3c6   : > { %v3915_v18 = vpop.eup %3914 }
 0x3c7   : > { %v1169_v19 = vmul.f32 %v3915_v18, %v4385_v23  ;;  %v1524_v22 = vpop.permute.xlu1 %1523  ;;  %v1480_v23 = vsel %vm1184_vm3, %v1475_v20, 0 }
 0x3c8   : > { %v1529_v53 = vsel %vm1184_vm3, %v1524_v22, 0 }
 0x3c9   : > { %3634 = vmatpush3.bf16.msra.mxu0 %v1529_v53  ;;  %v1177_v24 = vpack.c.bf16 %v1169_v19, %v1169_v19 }
 0x3ca   : > { %v3917_v52 = vpop.eup %3916  ;;  %3647 = vmatprep.subr.bf16.mxu0 %v4032_v2 }
 0x3cb   : > { %v1166_v27 = vmul.f32 %v3917_v52, %v4389_v33 }
 0x3cc   : > { %3636 = vmatmul.mubr.msk.bf16.vlgmr.msra.gmra.mrb[24].mxu0 %vm1081_vm2, %v1177_v24 }
 0x3cd   : > { %v1174_v32 = vpack.c.bf16 %v1166_v27, %v1166_v27  ;;  %3651 = vmatprep.mubr.msk.bf16.mxu0 %vm4033_vm0, %v4032_v2 }
 0x3ce   : > { %v3919_v21 = vpop.eup %3918 }
 0x3cf   : > { %3618 = vmatmul.mubr.msk.bf16.vlgmr.msra.gmra.mrb[32].mxu1 %vm1081_vm2, %v1174_v32  ;;  %v1168_v37 = vmul.f32 %v3919_v21, %v4393_v34 }
 0x3d0   : > { %3628 = vmatpush3.bf16.msra.mxu1 %v1480_v23  ;;  %3629 = vmatprep.mubr.msk.bf16.mxu1 %vm4033_vm0, %v4032_v2 }
 0x3d1   : > { %3639 = vmatprep.subr.bf16.mxu1 %v4032_v2  ;;  %v1176_v33 = vpack.c.bf16 %v1168_v37, %v1168_v37 }
 0x3d7   : > { %3630 = vmatmul.mubr.msk.bf16.vlgmr.msra.gmra.mrb[36].mxu1 %vm1081_vm2, %v1176_v33 }
 0x3d8   : > { %3643 = vmatprep.mubr.msk.bf16.mxu1 %vm4033_vm0, %v4032_v2  ;;  %3640 = vmatpush3.bf16.msra.mxu1 %v3862_v38 }
 0x3d9   : > { %3641 = vmatprep.subr.bf16.mxu1 %v4032_v2 }
 0x3dc   : > { %3642 = vmatpush3.bf16.msra.mxu1 %v3863_v39 }
 0x3dd   : > { %3655 = vmatprep.subr.bf16.mxu1 %v4032_v2 }
 0x459   : > { %v1222_v34 = vpop.f32.mrb[24].mxu1 }
 0x45a   : > { %v3595_v40 = vpop.f32.mrb[25].mxu1  ;;  %v1571_v45 = vsel %vm489_vm1, %v1222_v34, 0.0 }
 0x45b   : > { %v1225_v41 = vpop.f32.mrb[26].mxu1 }
 0x45c   : > { %v3596_v43 = vpop.f32.mrb[27].mxu1  ;;  %v3335_v41 = vld [vmem:[%s4877_s4] ss:$0 sm:$0xff] }
 0x461   : > { %v1271_v44 = vpop.f32.mrb[12].mxu0 }
 0x462   : > { %v1572_v47 = vsel %vm489_vm1, %v1271_v44, 0.0  ;;  %v3601_v30 = vpop.f32.mrb[13].mxu0 }
 0x463   : > { %v1573_v59 = vadd.f32 %v1572_v47, %v1571_v45  ;;  %v1274_v49 = vpop.f32.mrb[14].mxu0 }
 0x464   : > { %v3602_v50 = vpop.f32.mrb[15].mxu0 }
 0x469   : > { %v1320_v51 = vpop.f32.mrb[28].mxu1  ;;  %v1369_v42 = vpop.f32.mrb[16].mxu0 }
 0x46a   : > { %v1574_v46 = vsel %vm489_vm1, %v1320_v51, 0.0  ;;  %v3607_v48 = vpop.f32.mrb[29].mxu1  ;;  %v3613_v61 = vpop.f32.mrb[17].mxu0  ;;  %v1576_v4 = vsel %vm489_vm1, %v1369_v42, 0.0  ;;  %v3864_v42 = vld [vmem:[%s4880_s7] sm:$0xff]  }
 0x46b   : > { %v1575_v58 = vadd.f32 %v1574_v46, %v1573_v59  ;;  %v1323_v63 = vpop.f32.mrb[30].mxu1  ;;  %v1372_v0 = vpop.f32.mrb[18].mxu0  ;;  %3648 = vmatpush3.bf16.msra.mxu0 %v3864_v42  ;;  %v3865_v46 = vld [vmem:[%s4880_s7 + $0x8] sm:$0xff]  }
 0x46c   : > { %v3608_v5 = vpop.f32.mrb[31].mxu1  ;;  %v3614_v6 = vpop.f32.mrb[19].mxu0  ;;  %3649 = vmatprep.subr.bf16.mxu0 %v4032_v2 }
 0x46d   : > { %v1577_v12 = vadd.f32 %v1576_v4, %v1575_v58 }
 0x46f   : > { %3650 = vmatpush3.bf16.msra.mxu0 %v3865_v46 }
 0x470   : > { %3675 = vmatprep.subr.bf16.mxu0 %v4032_v2 }
 0x471   : > { %v1467_v13 = vpop.f32.mrb[20].mxu0 }
 0x472   : > { %v3625_v14 = vpop.f32.mrb[21].mxu0  ;;  %v1580_v52 = vsel %vm489_vm1, %v1467_v13, 0.0 }
 0x473   : > { %v1470_v15 = vpop.f32.mrb[22].mxu0  ;;  %v3340_v14 = vld [vmem:[%s4879_s6] ss:$0 sm:$0xff] }
 0x474   : > { %v3626_v36 = vpop.f32.mrb[23].mxu0 }
 0x49f   : > { %v1565_v62 = vpop.f32.mrb[24].mxu0 }
 0x4a0   : > { %v3637_v16 = vpop.f32.mrb[25].mxu0  ;;  %v1584_v38 = vsel %vm489_vm1, %v1565_v62, 0.0 }
 0x4a1   : > { %v1568_v17 = vpop.f32.mrb[26].mxu0  ;;  %v3866_v16 = vld [vmem:[%s4882_s9] sm:$0xff]  }
 0x4a2   : > { %v1418_v60 = vpop.f32.mrb[32].mxu1  ;;  %v3638_v18 = vpop.f32.mrb[27].mxu0  ;;  %v3867_v17 = vld [vmem:[%s4882_s9 + $0x8] sm:$0xff]  }
 0x4a3   : > { %v1578_v19 = vsel %vm489_vm1, %v1418_v60, 0.0  ;;  %v3619_v22 = vpop.f32.mrb[33].mxu1  ;;  %v3868_v60 = vld [vmem:[%s4882_s9 + $0x10] sm:$0xff]   ;;  %v3869_v18 = vld [vmem:[%s4882_s9 + $0x18] sm:$0xff]  }
 0x4a4   : > { %v1579_v53 = vadd.f32 %v1578_v19, %v1577_v12  ;;  %v1421_v24 = vpop.f32.mrb[34].mxu1  ;;  %v3339_v12 = vld [vmem:[%s4878_s5] ss:$0 sm:$0xff]  ;;  %v3871_v22 = vld [vmem:[%s4882_s9 + $0x28] sm:$0xff]  }
 0x4a5   : > { %v3620_v27 = vpop.f32.mrb[35].mxu1  ;;  %v3870_v19 = vld [vmem:[%s4882_s9 + $0x20] sm:$0xff]   ;;  %v3873_v24 = vld [vmem:[%s4882_s9 + $0x38] sm:$0xff]  }
 0x4a6   : > { %v1581_v20 = vadd.f32 %v1580_v52, %v1579_v53  ;;  %v3872_v53 = vld [vmem:[%s4882_s9 + $0x30] sm:$0xff]   ;;  %v3341_v52 = vld [vmem:[%s4881_s8] ss:$0 sm:$0xff] }
 0x4aa   : > { %v1516_v32 = vpop.f32.mrb[36].mxu1 }
 0x4ab   : > { %v1582_v21 = vsel %vm489_vm1, %v1516_v32, 0.0  ;;  %v3631_v23 = vpop.f32.mrb[37].mxu1 }
 0x4ac   : > { %v1583_v37 = vadd.f32 %v1582_v21, %v1581_v20  ;;  %v1519_v33 = vpop.f32.mrb[38].mxu1 }
 0x4ad   : > { %v3632_v39 = vpop.f32.mrb[39].mxu1 }
 0x4ae   : > { %v1585_v34 = vadd.f32 %v1584_v38, %v1583_v37 }
 0x4b0   : > { %v1586_v40 = vpack.c.bf16 %v1585_v34, %v1585_v34 }
 0x4b2   : > { %3644 = vmatmul.mubr.msk.bf16.vlgmr.msra.gmra.mrb[40].mxu1 %vm489_vm1, %v1586_v40 }
 0x4b3   : > { %3671 = vmatprep.mubr.msk.bf16.mxu1 %vm4033_vm0, %v4032_v2  ;;  %3656 = vmatpush3.bf16.msra.mxu1 %v3866_v16 }
 0x4b4   : > { %3657 = vmatprep.subr.bf16.mxu1 %v4032_v2 }
 0x4b7   : > { %3658 = vmatpush3.bf16.msra.mxu1 %v3867_v17 }
 0x4b8   : > { %3659 = vmatprep.subr.bf16.mxu1 %v4032_v2 }
 0x4bb   : > { %3660 = vmatpush3.bf16.msra.mxu1 %v3868_v60 }
 0x4bc   : > { %3661 = vmatprep.subr.bf16.mxu1 %v4032_v2 }
 0x4bf   : > { %3662 = vmatpush3.bf16.msra.mxu1 %v3869_v18 }
 0x4c0   : > { %3663 = vmatprep.subr.bf16.mxu1 %v4032_v2 }
 0x4c3   : > { %3664 = vmatpush3.bf16.msra.mxu1 %v3870_v19  ;;  %v3874_v19 = vld [vmem:[%s4895_s2 + $0x10] sm:$0xff]  }
 0x4c4   : > { %3665 = vmatprep.subr.bf16.mxu1 %v4032_v2 }
 0x4c7   : > { %3666 = vmatpush3.bf16.msra.mxu1 %v3871_v22  ;;  %v3875_v22 = vld [vmem:[%s4895_s2 + $0x18] sm:$0xff]  }
 0x4c8   : > { %3667 = vmatprep.subr.bf16.mxu1 %v4032_v2 }
 0x4cb   : > { %3668 = vmatpush3.bf16.msra.mxu1 %v3872_v53 }
 0x4cc   : > { %3669 = vmatprep.subr.bf16.mxu1 %v4032_v2 }
 0x4cf   : > { %3670 = vmatpush3.bf16.msra.mxu1 %v3873_v24 }
 0x4d0   : > { %3701 = vmatprep.subr.bf16.mxu1 %v4032_v2 }
 0x585   : > { %v1647_v43 = vpop.f32.mrb[40].mxu1 }
 0x586   : > { %v1648_v44 = vadd.f32 %v3335_v41, %v1647_v43  ;;  %v3645_v45 = vpop.f32.mrb[41].mxu1 }
 0x587   : > { %v1650_v47 = vpop.f32.mrb[42].mxu1 }
 0x588   : > { %v1653_v30 = vadd.f32 %v1648_v44, %v4179_v10  ;;  %v3646_v59 = vpop.f32.mrb[43].mxu1 }
 0x58a   : > { %v1656_v49 = vsel %vm489_vm1, %v1653_v30, 0.0  ;;  %v1661_v50 = vmul.f32 %v1653_v30, %v1653_v30 }
 0x58b   : > { %1657 = vadd.xlane.f32.xlu0 %v1656_v49 }
 0x58c   : > { %v1662_v51 = vsel %vm489_vm1, %v1661_v50, 0.0 }
 0x58d   : > { %1663 = vadd.xlane.f32.xlu1 %v1662_v51 }
 0x618   : > { %v1658_v10 = vpop.xlane.xlu0 %1657 }
 0x619   : > { %v1660_v48 = vmul.f32 0.03125, %v1658_v10 }
 0x61a   : > { %v1664_v61 = vpop.xlane.xlu1 %1663 }
 0x61b   : > { %v1666_v58 = vmul.f32 %v1660_v48, %v1660_v48  ;;  %v1665_v63 = vmul.f32 0.03125, %v1664_v61  ;;  %v1668_v5 = vsub.f32 %v1653_v30, %v1660_v48 }
 0x61d   : > { %v1667_v0 = vsub.f32 %v1665_v63, %v1666_v58 }
 0x61f   : > { %v1669_v4 = vadd.f32 1e-05, %v1667_v0 }
 0x621   : > { %3920 = vrsqrt.f32 %v1669_v4 }
 0x62b   : > { %v3921_v6 = vpop.eup %3920 }
 0x62c   : > { %v1671_v13 = vmul.f32 %v3921_v6, %v1668_v5  ;;  %v3345_v6 = vld [vmem:[%s4883_s10] ss:$0 sm:$0xff] }
 0x62e   : > { %v1678_v15 = vmul.f32 %v3339_v12, %v1671_v13 }
 0x630   : > { %v4483_v36 = vadd.f32 %v3340_v14, %v1678_v15 }
 0x632   : > { %v1686_v62 = vpack.c.bf16 %v4483_v36, %v4483_v36 }
 0x634   : > { %3652 = vmatmul.mubr.msk.bf16.vlgmr.msra.gmra.mrb[28].mxu0 %vm489_vm1, %v1686_v62 }
 0x635   : > { %3679 = vmatprep.mubr.msk.bf16.mxu0 %vm4033_vm0, %v4032_v2  ;;  %3676 = vmatpush3.bf16.msra.mxu0 %v3874_v19 }
 0x636   : > { %3677 = vmatprep.subr.bf16.mxu0 %v4032_v2 }
 0x639   : > { %3678 = vmatpush3.bf16.msra.mxu0 %v3875_v22 }
 0x63a   : > { %3683 = vmatprep.subr.bf16.mxu0 %v4032_v2 }
 0x707   : > { %v1747_v27 = vpop.f32.mrb[28].mxu0 }
 0x708   : > { %v1748_v20 = vadd.f32 %v3341_v52, %v1747_v27  ;;  %v3653_v32 = vpop.f32.mrb[29].mxu0 }
 0x709   : > { %v1750_v21 = vpop.f32.mrb[30].mxu0 }
 0x70a   : > { %v1754_v23 = vmul.f32 0.70710677, %v1748_v20  ;;  %v3654_v37 = vpop.f32.mrb[31].mxu0  ;;  %v1753_v63 = vmul.f32 0.5, %v1748_v20 }
 0x70b   : > { %v3354_v37 = vld [vmem:[%s4884_s11] ss:$0 sm:$0xff] }
 0x70c   : > { %v1755_v33 = vand.u32 2147483647, %v1754_v23  ;;  %vm1775_vm4 = vcmp.ge.f32.partialorder %v1754_v23, 0.0 }
 0x70e   : > { %v1756_v38 = vmul.f32 0.3275911, %v1755_v33  ;;  %v1769_v34 = vsub.f32 0.0, %v1755_v33 }
 0x710   : > { %v1757_v39 = vadd.f32 1.0, %v1756_v38  ;;  %v1770_v41 = vmul.f32 %v1769_v34, %v1755_v33  ;;  %v3355_v38 = vld [vmem:[%s4885_s12] ss:$0 sm:$0xff] }
 0x712   : > { %3922 = vrcp.f32 %v1757_v39  ;;  %v1771_v45 = vmul.f32 1.442695, %v1770_v41 }
 0x714   : > { %3924 = vpow2.f32 %v1771_v45 }
 0x71c   : > { %v3923_v40 = vpop.eup %3922 }
 0x71d   : > { %v1760_v43 = vmul.f32 1.0614054, %v3923_v40 }
 0x71e   : > { %v3925_v46 = vpop.eup %3924 }
 0x71f   : > { %v1761_v44 = vadd.f32 -1.4531521, %v1760_v43 }
 0x721   : > { %v1762_v47 = vmul.f32 %v3923_v40, %v1761_v44 }
 0x723   : > { %v1763_v30 = vadd.f32 1.4214138, %v1762_v47 }
 0x725   : > { %v1764_v59 = vmul.f32 %v3923_v40, %v1763_v30 }
 0x727   : > { %v1765_v49 = vadd.f32 -0.28449672, %v1764_v59 }
 0x729   : > { %v1766_v50 = vmul.f32 %v3923_v40, %v1765_v49 }
 0x72b   : > { %v1767_v51 = vadd.f32 0.2548296, %v1766_v50 }
 0x72d   : > { %v1768_v42 = vmul.f32 %v3923_v40, %v1767_v51 }
 0x72f   : > { %v1773_v10 = vmul.f32 %v3925_v46, %v1768_v42 }
 0x731   : > { %v1774_v48 = vsub.f32 1.0, %v1773_v10 }
 0x733   : > { %v1776_v61 = vsub.f32 0.0, %v1774_v48 }
 0x735   : > { %v1777_v58 = vsel %vm1775_vm4, %v1774_v48, %v1776_v61 }
 0x736   : > { %v1778_v0 = vadd.f32 1.0, %v1777_v58 }
 0x738   : > { %v1779_v4 = vmul.f32 %v1778_v0, %v1753_v63 }
 0x73a   : > { %v1780_v5 = vpack.c.bf16 %v1779_v4, %v1779_v4 }
 0x73c   : > { %3672 = vmatmul.mubr.bf16.vlgmr.msra.gmra.mrb[44].mxu1 %v1780_v5 }
 0x73d   : > { %3703 = vmatprep.mubr.msk.bf16.mxu1 %vm4033_vm0, %v4032_v2 }
 0x80f   : > { %v1886_v12 = vpop.f32.mrb[44].mxu1 }
 0x810   : > { %v1887_v13 = vadd.f32 %v3345_v6, %v1886_v12  ;;  %v3673_v14 = vpop.f32.mrb[45].mxu1 }
 0x811   : > { %v1889_v15 = vpop.f32.mrb[46].mxu1 }
 0x812   : > { %v1892_v62 = vadd.f32 %v1887_v13, %v4483_v36  ;;  %v3674_v16 = vpop.f32.mrb[47].mxu1 }
 0x814   : > { %v1895_v17 = vsel %vm489_vm1, %v1892_v62, 0.0  ;;  %v1899_v60 = vmul.f32 %v1892_v62, %v1892_v62 }
 0x815   : > { %1896 = vadd.xlane.f32.xlu0 %v1895_v17 }
 0x816   : > { %v1900_v18 = vsel %vm489_vm1, %v1899_v60, 0.0 }
 0x819   : > { %1901 = vadd.xlane.f32.xlu0 %v1900_v18 }
 0x8a2   : > { %v1897_v36 = vpop.xlane.xlu0 %1896 }
 0x8a3   : > { %v1898_v53 = vmul.f32 0.03125, %v1897_v36 }
 0x8a5   : > { %v1904_v52 = vmul.f32 %v1898_v53, %v1898_v53  ;;  %v1906_v21 = vsub.f32 %v1892_v62, %v1898_v53 }
 0x8a6   : > { %v1902_v24 = vpop.xlane.xlu0 %1901 }
 0x8a7   : > { %v1903_v27 = vmul.f32 0.03125, %v1902_v24 }
 0x8a9   : > { %v1905_v20 = vsub.f32 %v1903_v27, %v1904_v52 }
 0x8ab   : > { %v1907_v32 = vadd.f32 1e-05, %v1905_v20 }
 0x8ad   : > { %3926 = vrsqrt.f32 %v1907_v32 }
 0x8b7   : > { %v3927_v23 = vpop.eup %3926 }
 0x8b8   : > { %v1909_v33 = vmul.f32 %v3927_v23, %v1906_v21 }
 0x8ba   : > { %v1916_v39 = vmul.f32 %v3354_v37, %v1909_v33 }
 0x8bc   : > { %v4547_v34 = vadd.f32 %v3355_v38, %v1916_v39 }
 0x8be   : > { %v1924_v40 = vpack.c.bf16 %v4547_v34, %v4547_v34 }
 0x8c0   : > { %3680 = vmatmul.mubr.msk.bf16.vlgmr.msra.gmra.mrb[32].mxu0 %vm489_vm1, %v1924_v40 }
 0x8c1   : > { %3685 = vmatprep.mubr.msk.bf16.mxu0 %vm4033_vm0, %v4032_v2 }
 0x993   : > { %v1979_v41 = vpop.f32.mrb[32].mxu0 }
 0x994   : > { %v4554_v43 = vpack.c.bf16 %v1979_v41, %v1979_v41  ;;  %v3681_v44 = vpop.f32.mrb[33].mxu0 }
 0x995   : > { %v1982_v45 = vpop.f32.mrb[34].mxu0 }
 0x996   : > { %v3682_v47 = vpop.f32.mrb[35].mxu0  ;;  %v1987_v30 = vmul.bf16 %v4554_v43, %v4196_v56  ;;  %v1986_v59 = vmul.bf16 %v4554_v43, %v4192_v54  ;;  %v1990_v49 = vmul.bf16 %v4554_v43, %v4208_v1  ;;  %v1988_v50 = vmul.bf16 %v4554_v43, %v4194_v55 }
 0x997   : > { %v1992_v56 = vmul.bf16 %v4554_v43, %v4222_v8  ;;  %v1989_v54 = vmul.bf16 %v4554_v43, %v4198_v57  ;;  %v1994_v1 = vmul.bf16 %v4554_v43, %v4323_v26  ;;  %v1991_v55 = vmul.bf16 %v4554_v43, %v4210_v3 }
 0x998   : > { %2052 = vrot.lane.b32.xlu0 %v1987_v30, %s4036_s24  ;;  %2003 = vrot.lane.b32.xlu1 %v1986_v59, %s4036_s24  ;;  %v1993_v8 = vmul.bf16 %v4554_v43, %v4224_v9  ;;  %v1995_v57 = vmul.bf16 %v4554_v43, %v4318_v25 }
 0x99c   : > { %2190 = vrot.lane.b32.xlu0 %v1990_v49, %s4036_s24  ;;  %2098 = vrot.lane.b32.xlu1 %v1988_v50, %s4036_s24 }
 0x9a0   : > { %2282 = vrot.lane.b32.xlu0 %v1992_v56, %s4036_s24  ;;  %2144 = vrot.lane.b32.xlu1 %v1989_v54, %s4036_s24 }
 0x9a4   : > { %2478 = vrot.lane.b32.xlu0 %v1994_v1, %s4899_s20  ;;  %2236 = vrot.lane.b32.xlu1 %v1991_v55, %s4036_s24 }
 0x9a8   : > { %2328 = vrot.lane.b32.xlu1 %v1993_v8, %s4036_s24  ;;  %s3432_s24 = sshll.u32 %s4130_s29, 7  ;;  %s4038_s29 = smov [#allocation2]  }
 0x9a9   : > { %s3972_s23 = sshll.u32 %s4038_s29, 4  ;;  %s3973_s23 = int_to_ptr.vmem [resolvable:$false] %s3972_s23 }
 0x9aa   : > { %s3974_s30 = scalar_lea.vmem %s3973_s23, 256  ;;  %p3975_p0 = scmp.lt.s32.totalorder %s4832_s0, %s3973_s23 }
 0x9ab   : > { %p3976_p1 = scmp.lt.s32.totalorder %s3974_s30, %s3968_s16 }
 0x9ac   : > { %2527 = vrot.lane.b32.xlu1 %v1995_v57, %s4899_s20 }
 0x9ad   : > { %p3977_p2 = por %p3976_p1, %p3975_p0 }
 0x9af   : > { %p3978_p3 = pnand %p3977_p2, %p3971_p13 }
 0xa0a   : > { %v2004_v51 = vpop.permute.xlu1 %2003  ;;  %v2053_v42 = vpop.permute.xlu0 %2052 }
 0xa0b   : > { %v2009_v26 = vsel %vm489_vm1, %v2004_v51, 0  ;;  %v2055_v10 = vsel %vm489_vm1, %v2053_v42, 0 }
 0xa0c   : > { %3684 = vmatpush3.bf16.xpose.msra.mxu0 %v2009_v26 }
 0xa0d   : > { %3689 = vmatprep.subr.bf16.mxu0 %v4032_v2 }
 0xa0e   : > { %v2099_v3 = vpop.permute.xlu1 %2098  ;;  %v2191_v58 = vpop.permute.xlu0 %2190 }
 0xa0f   : > { %v2101_v48 = vsel %vm489_vm1, %v2099_v3, 0  ;;  %v2193_v0 = vsel %vm489_vm1, %v2191_v58, 0 }
 0xa12   : > { %v2145_v46 = vpop.permute.xlu1 %2144  ;;  %v2283_v5 = vpop.permute.xlu0 %2282 }
 0xa13   : > { %v2147_v9 = vsel %vm489_vm1, %v2145_v46, 0  ;;  %3686 = vmatmul.mubr.msk.bf16.vlgmr.msra.gmra.mrb[36].mxu0 %vm489_vm1, %v4554_v43  ;;  %v2285_v12 = vsel %vm489_vm1, %v2283_v5, 0  ;;  %v1997_v5 = vmul.bf16 %v4554_v43, %v4332_v31 }
 0xa14   : > { %3690 = vmatpush3.bf16.xpose.msra.mxu0 %v2055_v10  ;;  %3702 = vmatpush3.bf16.xpose.msra.mxu1 %v2147_v9 }
 0xa15   : > { %3691 = vmatprep.mubr.msk.bf16.mxu0 %vm4033_vm0, %v4032_v2  ;;  %3695 = vmatprep.subr.bf16.mxu0 %v4032_v2 }
 0xa16   : > { %3713 = vmatprep.subr.bf16.mxu1 %v4032_v2  ;;  %v2237_v25 = vpop.permute.xlu1 %2236  ;;  %v2479_v14 = vpop.permute.xlu0 %2478 }
 0xa17   : > { %v2239_v61 = vsel %vm489_vm1, %v2237_v25, 0  ;;  %v2484_v15 = vsel %vm1184_vm3, %v2479_v14, 0 }
 0xa1a   : > { %v2329_v63 = vpop.permute.xlu1 %2328 }
 0xa1b   : > { %3692 = vmatmul.mubr.msk.bf16.vlgmr.msra.gmra.mrb[40].mxu0 %vm489_vm1, %v4554_v43  ;;  %3704 = vmatmul.mubr.msk.bf16.vlgmr.msra.gmra.mrb[48].mxu1 %vm489_vm1, %v4554_v43  ;;  %v2331_v4 = vsel %vm489_vm1, %v2329_v63, 0 }
 0xa1c   : > { %3696 = vmatpush3.bf16.xpose.msra.mxu0 %v2101_v48  ;;  %3714 = vmatpush3.bf16.xpose.msra.mxu1 %v2239_v61 }
 0xa1d   : > { %3697 = vmatprep.mubr.msk.bf16.mxu0 %vm4033_vm0, %v4032_v2  ;;  %3715 = vmatprep.mubr.msk.bf16.mxu1 %vm4033_vm0, %v4032_v2 }
 0xa1e   : > { %3707 = vmatprep.subr.bf16.mxu0 %v4032_v2  ;;  %3725 = vmatprep.subr.bf16.mxu1 %v4032_v2  ;;  %v2528_v6 = vpop.permute.xlu1 %2527 }
 0xa1f   : > { %v2533_v13 = vsel %vm1184_vm3, %v2528_v6, 0 }
 0xa23   : > { %3698 = vmatmul.mubr.msk.bf16.vlgmr.msra.gmra.mrb[44].mxu0 %vm489_vm1, %v4554_v43  ;;  %3716 = vmatmul.mubr.msk.bf16.vlgmr.msra.gmra.mrb[52].mxu1 %vm489_vm1, %v4554_v43 }
 0xa24   : > { %3708 = vmatpush3.bf16.xpose.msra.mxu0 %v2193_v0  ;;  %3726 = vmatpush3.bf16.xpose.msra.mxu1 %v2331_v4  ;;  %v1996_v4 = vmul.bf16 %v4554_v43, %v4328_v28 }
 0xa25   : > { %3709 = vmatprep.mubr.msk.bf16.mxu0 %vm4033_vm0, %v4032_v2  ;;  %3727 = vmatprep.mubr.msk.bf16.mxu1 %vm4033_vm0, %v4032_v2 }
 0xa26   : > { %3719 = vmatprep.subr.bf16.mxu0 %v4032_v2  ;;  %3737 = vmatprep.subr.bf16.mxu1 %v4032_v2 }
 0xa2b   : > { %3710 = vmatmul.mubr.msk.bf16.vlgmr.msra.gmra.mrb[48].mxu0 %vm489_vm1, %v4554_v43  ;;  %3728 = vmatmul.mubr.msk.bf16.vlgmr.msra.gmra.mrb[56].mxu1 %vm489_vm1, %v4554_v43 }
 0xa2c   : > { %3720 = vmatpush3.bf16.xpose.msra.mxu0 %v2285_v12  ;;  %3738 = vmatpush3.bf16.msra.mxu1 %v2533_v13 }
 0xa2d   : > { %3721 = vmatprep.mubr.msk.bf16.mxu0 %vm4033_vm0, %v4032_v2  ;;  %3731 = vmatprep.subr.bf16.mxu0 %v4032_v2 }
 0xa2e   : > { %3739 = vmatprep.mubr.msk.bf16.mxu1 %vm4033_vm0, %v4032_v2  ;;  %3749 = vmatprep.subr.bf16.mxu1 %v4032_v2 }
 0xa33   : > { %3722 = vmatmul.mubr.msk.bf16.vlgmr.msra.gmra.mrb[52].mxu0 %vm489_vm1, %v4554_v43 }
 0xa34   : > { %3732 = vmatpush3.bf16.msra.mxu0 %v2484_v15  ;;  %3733 = vmatprep.mubr.msk.bf16.mxu0 %vm4033_vm0, %v4032_v2 }
 0xa35   : > { %3743 = vmatprep.subr.bf16.mxu0 %v4032_v2 }
 0xae6   : > { %v2045_v62 = vpop.f32.mrb[36].mxu0 }
 0xae7   : > { %v2373_v16 = vmul.f32 0.17677669, %v2045_v62  ;;  %v3687_v17 = vpop.f32.mrb[37].mxu0 }
 0xae8   : > { %v2048_v60 = vpop.f32.mrb[38].mxu0 }
 0xae9   : > { %v3688_v18 = vpop.f32.mrb[39].mxu0  ;;  %v2381_v19 = vsel %vm1081_vm2, %v2373_v16, -inf }
 0xaea   : > { %2382 = vmax.xlane.f32.xlu0 %v2381_v19 }
 0xaee   : > { %v2091_v22 = vpop.f32.mrb[40].mxu0  ;;  %v2183_v36 = vpop.f32.mrb[48].mxu1 }
 0xaef   : > { %v2374_v53 = vmul.f32 0.17677669, %v2091_v22  ;;  %v2376_v24 = vmul.f32 0.17677669, %v2183_v36  ;;  %v3693_v52 = vpop.f32.mrb[41].mxu0  ;;  %v3705_v27 = vpop.f32.mrb[49].mxu1 }
 0xaf0   : > { %v2094_v20 = vpop.f32.mrb[42].mxu0  ;;  %v2186_v32 = vpop.f32.mrb[50].mxu1 }
 0xaf1   : > { %v3694_v21 = vpop.f32.mrb[43].mxu0  ;;  %v3706_v23 = vpop.f32.mrb[51].mxu1  ;;  %v2384_v37 = vsel %vm1081_vm2, %v2374_v53, -inf  ;;  %v2390_v33 = vsel %vm1081_vm2, %v2376_v24, -inf  ;;  %v1998_v32 = vmul.bf16 %v4554_v43, %v4330_v29 }
 0xaf2   : > { %2385 = vmax.xlane.f32.xlu1 %v2384_v37  ;;  %2391 = vmax.xlane.f32.xlu0 %v2390_v33 }
 0xaf6   : > { %v2137_v38 = vpop.f32.mrb[44].mxu0  ;;  %v2275_v39 = vpop.f32.mrb[52].mxu1 }
 0xaf7   : > { %v4641_v40 = vmul.f32 0.17677669, %v2275_v39  ;;  %v3699_v41 = vpop.f32.mrb[45].mxu0  ;;  %v3717_v44 = vpop.f32.mrb[53].mxu1  ;;  %v2375_v30 = vmul.f32 0.17677669, %v2137_v38 }
 0xaf8   : > { %v2140_v45 = vpop.f32.mrb[46].mxu0  ;;  %v2278_v47 = vpop.f32.mrb[54].mxu1 }
 0xaf9   : > { %v3700_v59 = vpop.f32.mrb[47].mxu0  ;;  %v3718_v49 = vpop.f32.mrb[55].mxu1  ;;  %v2396_v50 = vsel %vm1081_vm2, %v4641_v40, -inf  ;;  %v2387_v56 = vsel %vm1081_vm2, %v2375_v30, -inf }
 0xafa   : > { %2397 = vmax.xlane.f32.xlu0 %v2396_v50 }
 0xafe   : > { %v2229_v54 = vpop.f32.mrb[48].mxu0  ;;  %2388 = vmax.xlane.f32.xlu0 %v2387_v56  ;;  %v2367_v1 = vpop.f32.mrb[56].mxu1 }
 0xaff   : > { %v2377_v55 = vmul.f32 0.17677669, %v2229_v54  ;;  %v2380_v8 = vmul.f32 0.17677669, %v2367_v1  ;;  %v3711_v57 = vpop.f32.mrb[49].mxu0  ;;  %v3729_v51 = vpop.f32.mrb[57].mxu1 }
 0xb00   : > { %v2232_v26 = vpop.f32.mrb[50].mxu0  ;;  %v2370_v3 = vpop.f32.mrb[58].mxu1  ;;  %v2000_v57 = vmul.bf16 %v4554_v43, %v4372_v11 }
 0xb01   : > { %v3712_v42 = vpop.f32.mrb[51].mxu0  ;;  %v3730_v46 = vpop.f32.mrb[59].mxu1  ;;  %v2393_v10 = vsel %vm1081_vm2, %v2377_v55, -inf  ;;  %v2402_v9 = vsel %vm1081_vm2, %v2380_v8, -inf }
 0xb02   : > { %2394 = vmax.xlane.f32.xlu1 %v2393_v10  ;;  %2403 = vmax.xlane.f32.xlu0 %v2402_v9 }
 0xb06   : > { %v2321_v25 = vpop.f32.mrb[52].mxu0 }
 0xb07   : > { %v2379_v48 = vmul.f32 0.17677669, %v2321_v25  ;;  %v3723_v61 = vpop.f32.mrb[53].mxu0 }
 0xb08   : > { %v2324_v58 = vpop.f32.mrb[54].mxu0 }
 0xb09   : > { %v3724_v63 = vpop.f32.mrb[55].mxu0  ;;  %v2399_v0 = vsel %vm1081_vm2, %v2379_v48, -inf }
 0xb0a   : > { %2400 = vmax.xlane.f32.xlu1 %v2399_v0 }
 0xb18   : > { %2576 = vrot.lane.b32.xlu0 %v1996_v4, %s4899_s20 }
 0xb1b   : > { %2625 = vrot.lane.b32.xlu1 %v1997_v5, %s4899_s20 }
 0xb77   : > { %v2383_v6 = vpop.xlane.xlu0 %2382 }
 0xb78   : > { %v2405_v12 = vsub.f32 %v2373_v16, %v2383_v6 }
 0xb7a   : > { %v2413_v13 = vmul.f32 1.442695, %v2405_v12 }
 0xb7c   : > { %3928 = vpow2.f32 %v2413_v13 }
 0xb7f   : > { %v2386_v14 = vpop.xlane.xlu1 %2385  ;;  %v2392_v15 = vpop.xlane.xlu0 %2391 }
 0xb80   : > { %v2406_v62 = vsub.f32 %v2374_v53, %v2386_v14  ;;  %v2408_v17 = vsub.f32 %v2376_v24, %v2392_v15  ;;  %v1999_v53 = vmul.bf16 %v4554_v43, %v4335_v35 }
 0xb82   : > { %v2419_v60 = vmul.f32 1.442695, %v2408_v17  ;;  %v2415_v18 = vmul.f32 1.442695, %v2406_v62 }
 0xb84   : > { %3930 = vpow2.f32 %v2419_v60 }
 0xb85   : > { %3932 = vpow2.f32 %v2415_v18 }
 0xb86   : > { %v3929_v19 = vpop.eup %3928 }
 0xb87   : > { %v2429_v28 = vsel %vm1081_vm2, %v3929_v19, 0.0  ;;  %v2398_v24 = vpop.xlane.xlu0 %2397 }
 0xb88   : > { %2430 = vadd.xlane.f32.xlu1 %v2429_v28  ;;  %v2410_v44 = vsub.f32 %v4641_v40, %v2398_v24 }
 0xb8a   : > { %v2423_v47 = vmul.f32 1.442695, %v2410_v44 }
 0xb8b   : > { %v2389_v52 = vpop.xlane.xlu0 %2388 }
 0xb8c   : > { %v2407_v27 = vsub.f32 %v2375_v30, %v2389_v52 }
 0xb8e   : > { %v4656_v22 = vpop.eup %3930  ;;  %v2417_v21 = vmul.f32 1.442695, %v2407_v27 }
 0xb8f   : > { %v2438_v31 = vsel %vm1081_vm2, %v4656_v22, 0.0  ;;  %v4660_v16 = vpop.eup %3932  ;;  %v2404_v20 = vpop.xlane.xlu0 %2403 }
 0xb90   : > { %2439 = vadd.xlane.f32.xlu0 %v2438_v31  ;;  %v2432_v36 = vsel %vm1081_vm2, %v4660_v16, 0.0  ;;  %v2412_v23 = vsub.f32 %v2380_v8, %v2404_v20  ;;  %v2395_v37 = vpop.xlane.xlu1 %2394  ;;  %3934 = vpow2.f32 %v2417_v21  ;;  %v2001_v8 = vmul.bf16 %v4554_v43, %v4370_v7 }
 0xb91   : > { %v2409_v33 = vsub.f32 %v2377_v55, %v2395_v37 }
 0xb92   : > { %v2427_v38 = vmul.f32 1.442695, %v2412_v23 }
 0xb93   : > { %v2421_v41 = vmul.f32 1.442695, %v2409_v33  ;;  %v2577_v3 = vpop.permute.xlu0 %2576 }
 0xb94   : > { %2433 = vadd.xlane.f32.xlu0 %v2432_v36  ;;  %3936 = vpow2.f32 %v2427_v38 }
 0xb95   : > { %3938 = vpow2.f32 %v2421_v41  ;;  %v3877_v41 = vld [vmem:[%s4898_s3 + $0x18] sm:$0xff]  }
 0xb97   : > { %v2401_v39 = vpop.xlane.xlu1 %2400 }
 0xb98   : > { %v2411_v35 = vsub.f32 %v2379_v48, %v2401_v39  ;;  %v2582_v48 = vsel %vm1184_vm3, %v2577_v3, 0  ;;  %v3876_v39 = vld [vmem:[%s4898_s3 + $0x10] sm:$0xff]   ;;  %s4830_s3 = scalar_lea.hbm %s4886_s13, %s3432_s24 }
 0xb99   : > { %2723 = vrot.lane.b32.xlu1 %v1999_v53, %s4899_s20 }
 0xb9a   : > { %v2425_v45 = vmul.f32 1.442695, %v2411_v35  ;;  %v3935_v30 = vpop.eup %3934 }
 0xb9b   : > { %v2435_v29 = vsel %vm1081_vm2, %v3935_v30, 0.0  ;;  %v2626_v51 = vpop.permute.xlu1 %2625 }
 0xb9c   : > { %3940 = vpow2.f32 %v2425_v45  ;;  %v2631_v58 = vsel %vm1184_vm3, %v2626_v51, 0 }
 0xb9d   : > { %3942 = vpow2.f32 %v2423_v47 }
 0xb9e   : > { %v4672_v59 = vpop.eup %3936 }
 0xb9f   : > { %v2450_v49 = vsel %vm1081_vm2, %v4672_v59, 0.0  ;;  %v4676_v50 = vpop.eup %3938 }
 0xba0   : > { %v2441_v40 = vsel %vm1081_vm2, %v4676_v50, 0.0 }
 0xba6   : > { %v4680_v56 = vpop.eup %3940 }
 0xba7   : > { %v4682_v54 = vpop.eup %3942  ;;  %v2447_v1 = vsel %vm1081_vm2, %v4680_v56, 0.0 }
 0xba8   : > { %v2444_v55 = vsel %vm1081_vm2, %v4682_v54, 0.0 }
 0xbaa   : > { %2674 = vrot.lane.b32.xlu0 %v1998_v32, %s4899_s20 }
 0xbbd   : > { %2436 = vadd.xlane.f32.xlu1 %v2435_v29 }
 0xbc1   : > { %2451 = vadd.xlane.f32.xlu1 %v2450_v49 }
 0xbc5   : > { %2442 = vadd.xlane.f32.xlu1 %v2441_v40 }
 0xbc9   : > { %2448 = vadd.xlane.f32.xlu1 %v2447_v1  ;;  %2445 = vadd.xlane.f32.xlu0 %v2444_v55 }
 0xbda   : > { %2821 = vrot.lane.b32.xlu1 %v2001_v8, %s4899_s20 }
 0xbdf   : > { %2772 = vrot.lane.b32.xlu0 %v2000_v57, %s4899_s20 }
 0xc15   : > { %v2431_v26 = vpop.xlane.xlu1 %2430 }
 0xc16   : > { %3944 = vrcp.f32 %v2431_v26 }
 0xc19   : > { %v2724_v0 = vpop.permute.xlu1 %2723 }
 0xc1a   : > { %v2729_v5 = vsel %vm1184_vm3, %v2724_v0, 0 }
 0xc1d   : > { %v2440_v42 = vpop.xlane.xlu0 %2439 }
 0xc20   : > { %v3945_v46 = vpop.eup %3944 }
 0xc21   : > { %v2461_v10 = vmul.f32 %v3945_v46, %v3929_v19  ;;  %v2434_v9 = vpop.xlane.xlu0 %2433 }
 0xc22   : > { %3946 = vrcp.f32 %v2434_v9 }
 0xc23   : > { %v2469_v25 = vpack.c.bf16 %v2461_v10, %v2461_v10  ;;  %3948 = vrcp.f32 %v2440_v42 }
 0xc25   : > { %3734 = vmatmul.mubr.msk.bf16.vlgmr.msra.gmra.mrb[56].mxu0 %vm1081_vm2, %v2469_v25  ;;  %v2675_v14 = vpop.permute.xlu0 %2674 }
 0xc26   : > { %3744 = vmatpush3.bf16.msra.mxu0 %v2582_v48  ;;  %3745 = vmatprep.mubr.msk.bf16.mxu0 %vm4033_vm0, %v4032_v2  ;;  %v2680_v19 = vsel %vm1184_vm3, %v2675_v14, 0 }
 0xc27   : > { %3755 = vmatprep.subr.bf16.mxu0 %v4032_v2 }
 0xc2c   : > { %v3947_v7 = vpop.eup %3946 }
 0xc2d   : > { %v2462_v11 = vmul.f32 %v3947_v7, %v4660_v16  ;;  %v3949_v61 = vpop.eup %3948 }
 0xc2e   : > { %v2464_v63 = vmul.f32 %v3949_v61, %v4656_v22 }
 0xc2f   : > { %v2470_v43 = vpack.c.bf16 %v2462_v11, %v2462_v11 }
 0xc30   : > { %v2472_v4 = vpack.c.bf16 %v2464_v63, %v2464_v63 }
 0xc31   : > { %3740 = vmatmul.mubr.msk.bf16.vlgmr.msra.gmra.mrb[60].mxu1 %vm1081_vm2, %v2470_v43 }
 0xc32   : > { %3750 = vmatpush3.bf16.msra.mxu1 %v2631_v58  ;;  %3751 = vmatprep.mubr.msk.bf16.mxu1 %vm4033_vm0, %v4032_v2 }
 0xc33   : > { %3761 = vmatprep.subr.bf16.mxu1 %v4032_v2 }
 0xc39   : > { %3752 = vmatmul.mubr.msk.bf16.vlgmr.msra.gmra.mrb[64].mxu1 %vm1081_vm2, %v2472_v4 }
 0xc3a   : > { %3762 = vmatpush3.bf16.msra.mxu1 %v2729_v5  ;;  %3763 = vmatprep.mubr.msk.bf16.mxu1 %vm4033_vm0, %v4032_v2 }
 0xc3b   : > { %3773 = vmatprep.subr.bf16.mxu1 %v4032_v2 }
 0xc4a   : > { %v2437_v6 = vpop.xlane.xlu1 %2436 }
 0xc4b   : > { %3950 = vrcp.f32 %v2437_v6 }
 0xc4e   : > { %v2452_v12 = vpop.xlane.xlu1 %2451 }
 0xc52   : > { %v2443_v13 = vpop.xlane.xlu1 %2442 }
 0xc53   : > { %3952 = vrcp.f32 %v2443_v13 }
 0xc55   : > { %v3951_v15 = vpop.eup %3950 }
 0xc56   : > { %v2463_v62 = vmul.f32 %v3951_v15, %v3935_v30  ;;  %v2449_v17 = vpop.xlane.xlu1 %2448  ;;  %v2446_v60 = vpop.xlane.xlu0 %2445 }
 0xc57   : > { %3954 = vrcp.f32 %v2449_v17 }
 0xc58   : > { %3956 = vrcp.f32 %v2446_v60  ;;  %v2471_v18 = vpack.c.bf16 %v2463_v62, %v2463_v62 }
 0xc59   : > { %3958 = vrcp.f32 %v2452_v12 }
 0xc5a   : > { %3746 = vmatmul.mubr.msk.bf16.vlgmr.msra.gmra.mrb[60].mxu0 %vm1081_vm2, %v2471_v18  ;;  %v2773_v31 = vpop.permute.xlu0 %2772  ;;  %v2822_v20 = vpop.permute.xlu1 %2821 }
 0xc5b   : > { %3756 = vmatpush3.bf16.msra.mxu0 %v2680_v19  ;;  %3757 = vmatprep.mubr.msk.bf16.mxu0 %vm4033_vm0, %v4032_v2  ;;  %v2778_v24 = vsel %vm1184_vm3, %v2773_v31, 0  ;;  %v2827_v23 = vsel %vm1184_vm3, %v2822_v20, 0 }
 0xc5c   : > { %3767 = vmatprep.subr.bf16.mxu0 %v4032_v2 }
 0xc5d   : > { %v3953_v28 = vpop.eup %3952 }
 0xc5e   : > { %v2465_v22 = vmul.f32 %v3953_v28, %v4676_v50 }
 0xc60   : > { %v2473_v16 = vpack.c.bf16 %v2465_v22, %v2465_v22 }
 0xc61   : > { %v3955_v36 = vpop.eup %3954 }
 0xc62   : > { %v3957_v53 = vpop.eup %3956  ;;  %3758 = vmatmul.mubr.msk.bf16.vlgmr.msra.gmra.mrb[64].mxu0 %vm1081_vm2, %v2473_v16  ;;  %v2467_v27 = vmul.f32 %v3955_v36, %v4680_v56  ;;  %v3384_v36 = vld [vmem:[%s4877_s4 + $0x1] ss:$0 sm:$0xff] }
 0xc63   : > { %v2466_v52 = vmul.f32 %v3957_v53, %v4682_v54  ;;  %3768 = vmatpush3.bf16.msra.mxu0 %v2778_v24  ;;  %3769 = vmatprep.mubr.msk.bf16.mxu0 %vm4033_vm0, %v4032_v2  ;;  %v3959_v21 = vpop.eup %3958 }
 0xc64   : > { %3779 = vmatprep.subr.bf16.mxu0 %v4032_v2  ;;  %v2475_v37 = vpack.c.bf16 %v2467_v27, %v2467_v27  ;;  %v2468_v33 = vmul.f32 %v3959_v21, %v4672_v59 }
 0xc65   : > { %v2474_v32 = vpack.c.bf16 %v2466_v52, %v2466_v52 }
 0xc66   : > { %v2476_v38 = vpack.c.bf16 %v2468_v33, %v2468_v33  ;;  %v3878_v33 = vld [vmem:[%s4880_s7 + $0x10] sm:$0xff]  }
 0xc67   : > { %3764 = vmatmul.mubr.msk.bf16.vlgmr.msra.gmra.mrb[68].mxu1 %vm1081_vm2, %v2474_v32 }
 0xc68   : > { %3774 = vmatpush3.bf16.msra.mxu1 %v2827_v23  ;;  %3775 = vmatprep.mubr.msk.bf16.mxu1 %vm4033_vm0, %v4032_v2 }
 0xc69   : > { %3787 = vmatprep.subr.bf16.mxu1 %v4032_v2 }
 0xc6a   : > { %3770 = vmatmul.mubr.msk.bf16.vlgmr.msra.gmra.mrb[68].mxu0 %vm1081_vm2, %v2475_v37 }
 0xc6b   : > { %3783 = vmatprep.mubr.msk.bf16.mxu0 %vm4033_vm0, %v4032_v2  ;;  %3780 = vmatpush3.bf16.msra.mxu0 %v3876_v39 }
 0xc6c   : > { %3781 = vmatprep.subr.bf16.mxu0 %v4032_v2 }
 0xc6f   : > { %3776 = vmatmul.mubr.msk.bf16.vlgmr.msra.gmra.mrb[72].mxu1 %vm1081_vm2, %v2476_v38  ;;  %3782 = vmatpush3.bf16.msra.mxu0 %v3877_v41  ;;  %v3879_v38 = vld [vmem:[%s4880_s7 + $0x18] sm:$0xff]  }
 0xc70   : > { %3791 = vmatprep.mubr.msk.bf16.mxu1 %vm4033_vm0, %v4032_v2  ;;  %3795 = vmatprep.subr.bf16.mxu0 %v4032_v2 }
 0xc71   : > { %3788 = vmatpush3.bf16.msra.mxu1 %v3878_v33 }
 0xc72   : > { %3789 = vmatprep.subr.bf16.mxu1 %v4032_v2 }
 0xc75   : > { %3790 = vmatpush3.bf16.msra.mxu1 %v3879_v38 }
 0xcf8   : > { %v2520_v35 = vpop.f32.mrb[56].mxu0 }
 0xcf9   : > { %v3735_v44 = vpop.f32.mrb[57].mxu0  ;;  %v2869_v29 = vsel %vm489_vm1, %v2520_v35, 0.0 }
 0xcfa   : > { %v2523_v45 = vpop.f32.mrb[58].mxu0 }
 0xcfb   : > { %v3736_v47 = vpop.f32.mrb[59].mxu0 }
 0xd04   : > { %v2569_v30 = vpop.f32.mrb[60].mxu1 }
 0xd05   : > { %v2870_v59 = vsel %vm489_vm1, %v2569_v30, 0.0  ;;  %v3741_v49 = vpop.f32.mrb[61].mxu1 }
 0xd06   : > { %v2871_v50 = vadd.f32 %v2870_v59, %v2869_v29  ;;  %v2572_v40 = vpop.f32.mrb[62].mxu1  ;;  %v3390_v59 = vld [vmem:[%s4878_s5 + $0x1] ss:$0 sm:$0xff] }
 0xd07   : > { %v3742_v56 = vpop.f32.mrb[63].mxu1 }
 0xd0c   : > { %v2667_v54 = vpop.f32.mrb[64].mxu1 }
 0xd0d   : > { %v3753_v1 = vpop.f32.mrb[65].mxu1  ;;  %v2874_v46 = vsel %vm489_vm1, %v2667_v54, 0.0 }
 0xd0e   : > { %v2670_v55 = vpop.f32.mrb[66].mxu1  ;;  %v3880_v1 = vld [vmem:[%s4882_s9 + $0x40] sm:$0xff]  }
 0xd0f   : > { %v3754_v8 = vpop.f32.mrb[67].mxu1  ;;  %v3881_v55 = vld [vmem:[%s4882_s9 + $0x48] sm:$0xff]  }
 0xd10   : > { %v3882_v8 = vld [vmem:[%s4882_s9 + $0x50] sm:$0xff]  }
 0xd2d   : > { %v2618_v57 = vpop.f32.mrb[60].mxu0 }
 0xd2e   : > { %v2872_v51 = vsel %vm489_vm1, %v2618_v57, 0.0  ;;  %v3747_v26 = vpop.f32.mrb[61].mxu0  ;;  %v3883_v57 = vld [vmem:[%s4882_s9 + $0x58] sm:$0xff]  }
 0xd2f   : > { %v2873_v3 = vadd.f32 %v2872_v51, %v2871_v50  ;;  %v2621_v42 = vpop.f32.mrb[62].mxu0  ;;  %v3391_v50 = vld [vmem:[%s4879_s6 + $0x1] ss:$0 sm:$0xff]  ;;  %v3885_v26 = vld [vmem:[%s4882_s9 + $0x68] sm:$0xff]  }
 0xd30   : > { %v3748_v10 = vpop.f32.mrb[63].mxu0  ;;  %v3884_v51 = vld [vmem:[%s4882_s9 + $0x60] sm:$0xff]   ;;  %v3887_v42 = vld [vmem:[%s4882_s9 + $0x78] sm:$0xff]  }
 0xd31   : > { %v2875_v9 = vadd.f32 %v2874_v46, %v2873_v3  ;;  %v3886_v3 = vld [vmem:[%s4882_s9 + $0x70] sm:$0xff]   ;;  %v3397_v46 = vld [vmem:[%s4881_s8 + $0x1] ss:$0 sm:$0xff] }
 0xd35   : > { %v2716_v25 = vpop.f32.mrb[64].mxu0 }
 0xd36   : > { %v2876_v48 = vsel %vm489_vm1, %v2716_v25, 0.0  ;;  %v3759_v7 = vpop.f32.mrb[65].mxu0 }
 0xd37   : > { %v2877_v11 = vadd.f32 %v2876_v48, %v2875_v9  ;;  %v2719_v43 = vpop.f32.mrb[66].mxu0 }
 0xd38   : > { %v3760_v61 = vpop.f32.mrb[67].mxu0 }
 0xd3a   : > { %v2765_v58 = vpop.f32.mrb[68].mxu1 }
 0xd3b   : > { %v2878_v63 = vsel %vm489_vm1, %v2765_v58, 0.0  ;;  %v3765_v0 = vpop.f32.mrb[69].mxu1 }
 0xd3c   : > { %v2879_v4 = vadd.f32 %v2878_v63, %v2877_v11  ;;  %v2768_v5 = vpop.f32.mrb[70].mxu1 }
 0xd3d   : > { %v3766_v6 = vpop.f32.mrb[71].mxu1  ;;  %v2814_v12 = vpop.f32.mrb[68].mxu0 }
 0xd3e   : > { %v2880_v13 = vsel %vm489_vm1, %v2814_v12, 0.0  ;;  %v3771_v14 = vpop.f32.mrb[69].mxu0 }
 0xd3f   : > { %v2881_v15 = vadd.f32 %v2880_v13, %v2879_v4  ;;  %v2817_v62 = vpop.f32.mrb[70].mxu0 }
 0xd40   : > { %v3772_v17 = vpop.f32.mrb[71].mxu0 }
 0xd42   : > { %v2863_v60 = vpop.f32.mrb[72].mxu1 }
 0xd43   : > { %v2882_v18 = vsel %vm489_vm1, %v2863_v60, 0.0  ;;  %v3777_v19 = vpop.f32.mrb[73].mxu1 }
 0xd44   : > { %v2883_v28 = vadd.f32 %v2882_v18, %v2881_v15  ;;  %v2866_v22 = vpop.f32.mrb[74].mxu1 }
 0xd45   : > { %v3778_v31 = vpop.f32.mrb[75].mxu1 }
 0xd46   : > { %v2884_v16 = vpack.c.bf16 %v2883_v28, %v2883_v28 }
 0xd48   : > { %3784 = vmatmul.mubr.msk.bf16.vlgmr.msra.gmra.mrb[72].mxu0 %vm489_vm1, %v2884_v16 }
 0xd49   : > { %3811 = vmatprep.mubr.msk.bf16.mxu0 %vm4033_vm0, %v4032_v2  ;;  %3796 = vmatpush3.bf16.msra.mxu0 %v3880_v1 }
 0xd4a   : > { %3797 = vmatprep.subr.bf16.mxu0 %v4032_v2 }
 0xd4d   : > { %3798 = vmatpush3.bf16.msra.mxu0 %v3881_v55 }
 0xd4e   : > { %3799 = vmatprep.subr.bf16.mxu0 %v4032_v2 }
 0xd51   : > { %3800 = vmatpush3.bf16.msra.mxu0 %v3882_v8 }
 0xd52   : > { %3801 = vmatprep.subr.bf16.mxu0 %v4032_v2 }
 0xd55   : > { %3802 = vmatpush3.bf16.msra.mxu0 %v3883_v57 }
 0xd56   : > { %3803 = vmatprep.subr.bf16.mxu0 %v4032_v2 }
 0xd59   : > { %3804 = vmatpush3.bf16.msra.mxu0 %v3884_v51 }
 0xd5a   : > { %3805 = vmatprep.subr.bf16.mxu0 %v4032_v2 }
 0xd5d   : > { %3806 = vmatpush3.bf16.msra.mxu0 %v3885_v26 }
 0xd5e   : > { %3807 = vmatprep.subr.bf16.mxu0 %v4032_v2 }
 0xd61   : > { %3808 = vmatpush3.bf16.msra.mxu0 %v3886_v3 }
 0xd62   : > { %3809 = vmatprep.subr.bf16.mxu0 %v4032_v2 }
 0xd65   : > { %3810 = vmatpush3.bf16.msra.mxu0 %v3887_v42 }
 0xe1b   : > { %v2947_v53 = vpop.f32.mrb[72].mxu0 }
 0xe1c   : > { %v2948_v24 = vadd.f32 %v3384_v36, %v2947_v53  ;;  %v3785_v52 = vpop.f32.mrb[73].mxu0 }
 0xe1d   : > { %v2950_v27 = vpop.f32.mrb[74].mxu0  ;;  %v3418_v52 = vld [vmem:[%s4883_s10 + $0x1] ss:$0 sm:$0xff] }
 0xe1e   : > { %v2953_v20 = vadd.f32 %v2948_v24, %v4547_v34  ;;  %v3786_v32 = vpop.f32.mrb[75].mxu0 }
 0xe20   : > { %v2958_v21 = vsel %vm489_vm1, %v2953_v20, 0.0  ;;  %v2962_v23 = vmul.f32 %v2953_v20, %v2953_v20 }
 0xe21   : > { %2959 = vadd.xlane.f32.xlu0 %v2958_v21 }
 0xe22   : > { %v2963_v37 = vsel %vm489_vm1, %v2962_v23, 0.0 }
 0xe23   : > { %2964 = vadd.xlane.f32.xlu1 %v2963_v37 }
 0xeae   : > { %v2960_v34 = vpop.xlane.xlu0 %2959 }
 0xeaf   : > { %v2961_v39 = vmul.f32 0.03125, %v2960_v34 }
 0xeb0   : > { %v2965_v41 = vpop.xlane.xlu1 %2964 }
 0xeb1   : > { %v2967_v35 = vmul.f32 %v2961_v39, %v2961_v39  ;;  %v2966_v44 = vmul.f32 0.03125, %v2965_v41  ;;  %v2969_v30 = vsub.f32 %v2953_v20, %v2961_v39 }
 0xeb3   : > { %v2968_v45 = vsub.f32 %v2966_v44, %v2967_v35 }
 0xeb5   : > { %v2970_v47 = vadd.f32 1e-05, %v2968_v45 }
 0xeb7   : > { %3960 = vrsqrt.f32 %v2970_v47 }
 0xec1   : > { %v3961_v29 = vpop.eup %3960 }
 0xec2   : > { %v2972_v49 = vmul.f32 %v3961_v29, %v2969_v30 }
 0xec4   : > { %v2979_v40 = vmul.f32 %v3390_v59, %v2972_v49  ;;  %v3429_v49 = vld [vmem:[%s4884_s11 + $0x1] ss:$0 sm:$0xff] }
 0xec6   : > { %v4774_v56 = vadd.f32 %v3391_v50, %v2979_v40  ;;  %v3430_v40 = vld [vmem:[%s4885_s12 + $0x1] ss:$0 sm:$0xff] }
 0xec8   : > { %v2987_v54 = vpack.c.bf16 %v4774_v56, %v4774_v56 }
 0xeca   : > { %3792 = vmatmul.mubr.msk.bf16.vlgmr.msra.gmra.mrb[76].mxu1 %vm489_vm1, %v2987_v54 }
 0xf9d   : > { %v3050_v10 = vpop.f32.mrb[76].mxu1 }
 0xf9e   : > { %v3051_v9 = vadd.f32 %v3397_v46, %v3050_v10  ;;  %v3793_v25 = vpop.f32.mrb[77].mxu1 }
 0xf9f   : > { %v3053_v48 = vpop.f32.mrb[78].mxu1 }
 0xfa0   : > { %v3057_v7 = vmul.f32 0.70710677, %v3051_v9  ;;  %v3794_v11 = vpop.f32.mrb[79].mxu1  ;;  %v3056_v16 = vmul.f32 0.5, %v3051_v9 }
 0xfa2   : > { %v3058_v43 = vand.u32 2147483647, %v3057_v7  ;;  %vm3078_vm5 = vcmp.ge.f32.partialorder %v3057_v7, 0.0 }
 0xfa4   : > { %v3059_v61 = vmul.f32 0.3275911, %v3058_v43  ;;  %v3072_v2 = vsub.f32 0.0, %v3058_v43 }
 0xfa6   : > { %v3060_v58 = vadd.f32 1.0, %v3059_v61  ;;  %v3073_v0 = vmul.f32 %v3072_v2, %v3058_v43 }
 0xfa8   : > { %3962 = vrcp.f32 %v3060_v58  ;;  %v3074_v6 = vmul.f32 1.442695, %v3073_v0 }
 0xfaa   : > { %3964 = vpow2.f32 %v3074_v6 }
 0xfb2   : > { %v3963_v63 = vpop.eup %3962 }
 0xfb3   : > { %v3063_v4 = vmul.f32 1.0614054, %v3963_v63 }
 0xfb4   : > { %v3965_v18 = vpop.eup %3964 }
 0xfb5   : > { %v3064_v5 = vadd.f32 -1.4531521, %v3063_v4 }
 0xfb7   : > { %v3065_v12 = vmul.f32 %v3963_v63, %v3064_v5 }
 0xfb9   : > { %v3066_v13 = vadd.f32 1.4214138, %v3065_v12 }
 0xfbb   : > { %v3067_v14 = vmul.f32 %v3963_v63, %v3066_v13 }
 0xfbd   : > { %v3068_v15 = vadd.f32 -0.28449672, %v3067_v14 }
 0xfbf   : > { %v3069_v62 = vmul.f32 %v3963_v63, %v3068_v15 }
 0xfc1   : > { %v3070_v17 = vadd.f32 0.2548296, %v3069_v62 }
 0xfc3   : > { %v3071_v60 = vmul.f32 %v3963_v63, %v3070_v17 }
 0xfc5   : > { %v3076_v19 = vmul.f32 %v3965_v18, %v3071_v60 }
 0xfc7   : > { %v3077_v28 = vsub.f32 1.0, %v3076_v19 }
 0xfc9   : > { %v3079_v22 = vsub.f32 0.0, %v3077_v28 }
 0xfcb   : > { %v3080_v31 = vsel %vm3078_vm5, %v3077_v28, %v3079_v22 }
 0xfcc   : > { %v3081_v36 = vadd.f32 1.0, %v3080_v31 }
 0xfce   : > { %v3082_v53 = vmul.f32 %v3081_v36, %v3056_v16 }
 0xfd0   : > { %v3083_v24 = vpack.c.bf16 %v3082_v53, %v3082_v53 }
 0xfd2   : > { %3812 = vmatmul.mubr.bf16.vlgmr.msra.gmra.mrb[76].mxu0 %v3083_v24 }
0x10a5   : > { %v3191_v27 = vpop.f32.mrb[76].mxu0 }
0x10a6   : > { %v3192_v20 = vadd.f32 %v3418_v52, %v3191_v27  ;;  %v3813_v32 = vpop.f32.mrb[77].mxu0 }
0x10a7   : > { %v3194_v21 = vpop.f32.mrb[78].mxu0 }
0x10a8   : > { %v3197_v23 = vadd.f32 %v3192_v20, %v4774_v56  ;;  %v3814_v37 = vpop.f32.mrb[79].mxu0 }
0x10aa   : > { %v3202_v33 = vsel %vm489_vm1, %v3197_v23, 0.0  ;;  %v3206_v38 = vmul.f32 %v3197_v23, %v3197_v23 }
0x10ab   : > { %3203 = vadd.xlane.f32.xlu0 %v3202_v33 }
0x10ac   : > { %v3207_v34 = vsel %vm489_vm1, %v3206_v38, 0.0 }
0x10af   : > { %3208 = vadd.xlane.f32.xlu0 %v3207_v34 }
0x1138   : > { %v3204_v39 = vpop.xlane.xlu0 %3203 }
0x1139   : > { %v3205_v41 = vmul.f32 0.03125, %v3204_v39 }
0x113b   : > { %v3211_v44 = vmul.f32 %v3205_v41, %v3205_v41  ;;  %v3213_v29 = vsub.f32 %v3197_v23, %v3205_v41 }
0x113c   : > { %v3209_v35 = vpop.xlane.xlu0 %3208 }
0x113d   : > { %v3210_v45 = vmul.f32 0.03125, %v3209_v35 }
0x113f   : > { %v3212_v47 = vsub.f32 %v3210_v45, %v3211_v44 }
0x1141   : > { %v3214_v30 = vadd.f32 1e-05, %v3212_v47 }
0x1143   : > { %3966 = vrsqrt.f32 %v3214_v30 }
0x114d   : > { %v3967_v59 = vpop.eup %3966 }
0x114e   : > { %v3216_v50 = vmul.f32 %v3967_v59, %v3213_v29 }
0x1150   : > { %v3223_v56 = vmul.f32 %v3429_v49, %v3216_v50 }
0x1152   : > { %v3230_v54 = vadd.f32 %v3430_v40, %v3223_v56 }
0x1154   : > { %3231 = vst.msk [vmem:[%s431_s21] sm:$0xff] %vm489_vm1, %v3230_v54 }
0x1155   : > { %3981 = shalt.err (!%p3978_p3)
}
0x1156   : > { %s3982_s1 = scalar_lea.hbm %s4830_s3, 128  ;;  %s3986_s20 = scalar_lea.hbm %s4886_s13, 256 }
0x1157   : > { %p3983_p4 = scmp.ne.s32.totalorder %s4830_s3, %s3982_s1  ;;  %p3987_p9 = scmp.lt.u32.totalorder %s4830_s3, %s4886_s13 }
0x1158   : > { %p3988_p10 = scmp.lt.u32.totalorder %s3986_s20, %s3982_s1  ;;  %p3990_p12 = scmp.lt.u32.totalorder %s3982_s1, %s4830_s3 }
0x1159   : > { %p3984_p7 = pnand %p3983_p4, %p4147_p5 }
0x115a   : > { %p3989_p11 = por %p3988_p10, %p3987_p9 }
0x115b   : > { %p3985_p8 = pneg %p3984_p7 }
0x115c   : > { %p3991_p13 = por %p3990_p12, %p3989_p11 }
0x115e   : > { %p3992_p0 = pnand %p3991_p13, %p3985_p8 }
0x1160   : > { %3995 = shalt.err (!%p3992_p0)
}
0x1161   : > { %3815 = dma.vmem_to_hbm [thread:$0]  (%p4147_p5), %s4832_s0, 128, %s4830_s3, %s3233_s15  }
0x1162 PF: > { %p3821_p1 = scmp.ge.s32.totalorder %s4030_s28, 2  ;;  %s3258_s16 = sand.u32 1, %s4018_s25  }
0x1163   : > { %s3259_s29 = scalar_lea.sflag [#allocation3], %s3258_s16 }
0x1164   : > { %p3818_p2 = pnand %p3821_p1, %p4151_p6 }
0x1166   : > { %4013 = dma.done.wait (!%p3818_p2), %s3259_s29, 128  }
0x1167   : > { %4015 = vsyncadd (!%p3818_p2), %s3259_s29, 4294967168  ;;  %p23_p3 = scmp.ge.s32.totalorder %s4134_s14, 4   ;;  %s4900_s25 = smov %s4022_s26 }
0x1168   : > { %s4901_s26 = smov %s4026_s27  ;;  %s4902_s27 = smov %s4145_s17 }
0x1169   : > { %s4903_s28 = smov %s4134_s14  ;;  %25 = sbr.rel (!%p23_p3) target bundleno = 8 (0x8), region = 118 }
0x1170   :  { %3264 = vsyncpa [#allocation3], 1 }
0x1171   :  { %3266 = vsyncpa [#allocation3 + $0x1], 1 }

</bundles_post_ra>
